<compile_context>
chip_gen: v7x
topology: tpu7x:2x2x1
jax: 0.10.0
libtpu: 0.0.40
codegen_flags: <defaults>
</compile_context>

<pallas_src>
import jax
import jax.numpy as jnp
from jax.experimental import pallas as pl
from jax.experimental.pallas import tpu as pltpu


def _ffn_kernel(act_ref, w1t_ref, b1_ref, w2t_ref, b2_ref, out_ref, acc_ref):
    # act_ref : (1, tS, H)  bf16     w1t_ref: (H, tF)  bf16     b1_ref: (1, tF)
    # w2t_ref : (tF, H)     bf16     b2_ref : (1, H)            out_ref: (1, tS, H)
    # acc_ref : (tS, H) f32 scratch, carried across the F (innermost) grid axis.
    f = pl.program_id(2)

    @pl.when(f == 0)
    def _init():
        # Seed the accumulator with the output bias -> no separate full-tile add later.
        acc_ref[...] = jnp.broadcast_to(
            b2_ref[...].astype(jnp.float32), acc_ref.shape)

    x = act_ref[0]  # [tS, H], stays bf16 so the MXU runs its native bf16xbf16->f32 path

    # op13 (chunked over F): x @ W1^T + b1, tanh-GELU (ttnn.gelu default).
    h = jnp.dot(x, w1t_ref[...], preferred_element_type=jnp.float32)      # [tS, tF] f32
    h = h + b1_ref[...].astype(jnp.float32)                               # bcast over rows
    h = jax.nn.gelu(h, approximate=True)                                  # f32 math (v5e-safe)
    h = h.astype(w2t_ref.dtype)                                           # bf16 for 2nd MXU pass

    # op14 (partial): y += h @ W2^T chunk, f32 accumulation in VMEM.
    acc_ref[...] += jnp.dot(h, w2t_ref[...], preferred_element_type=jnp.float32)

    @pl.when(f == pl.num_programs(2) - 1)
    def _finalize():
        out_ref[0] = acc_ref[...].astype(out_ref.dtype)


def _pick_tile(dim, candidates):
    for c in candidates:
        if dim % c == 0:
            return c
    return dim


def _ffn_pallas(act3, w1t, b1, w2t, b2, tile_s, tile_f):
    B, S, H = act3.shape
    F = w1t.shape[1]
    # Seq tile: >=256 helps fill the 256-wide MXU on v6e/v7x; 128 is fine on v5e.
    tS = tile_s if tile_s is not None else _pick_tile(S, (512, 384, 256, 128))
    tF = tile_f if tile_f is not None else _pick_tile(F, (1024, 512, 256, 128))
    assert S % tS == 0 and F % tF == 0

    grid = (B, S // tS, F // tF)

    itemsize = jnp.dtype(act3.dtype).itemsize
    cost = pl.CostEstimate(
        flops=4 * B * S * H * F,                # two matmuls: 2*B*S*H*F each
        transcendentals=B * S * F,              # tanh in GELU
        bytes_accessed=(B * S * H * 2 * itemsize            # act in + out
                        + 2 * H * F * itemsize               # W1^T + W2^T
                        + (F + H) * itemsize),                # biases
    )

    return pl.pallas_call(
        _ffn_kernel,
        out_shape=jax.ShapeDtypeStruct((B, S, H), act3.dtype),
        grid_spec=pltpu.PrefetchScalarGridSpec(
            num_scalar_prefetch=0,
            grid=grid,
            in_specs=[
                pl.BlockSpec((1, tS, H), lambda b, s, f: (b, s, 0)),  # activation tile (resident over f)
                pl.BlockSpec((H, tF),   lambda b, s, f: (0, f)),      # W1^T chunk, streams over F
                pl.BlockSpec((1, tF),   lambda b, s, f: (0, f)),      # b1 chunk
                pl.BlockSpec((tF, H),   lambda b, s, f: (f, 0)),      # W2^T chunk, streams over F
                pl.BlockSpec((1, H),    lambda b, s, f: (0, 0)),      # b2 (tiny, effectively resident)
            ],
            out_specs=pl.BlockSpec((1, tS, H), lambda b, s, f: (b, s, 0)),
            scratch_shapes=[pltpu.VMEM((tS, H), jnp.float32)],
        ),
        compiler_params=pltpu.CompilerParams(
            dimension_semantics=("parallel", "parallel", "arbitrary"),
            # Explicit budget: comfortably fits BERT-large tiles double-buffered,
            # and stays below v7x's 64 MiB physical VMEM per TensorCore.
            vmem_limit_bytes=48 * 1024 * 1024,
        ),
        cost_estimate=cost,
    )(act3, w1t, b1, w2t, b2)


def make_tt_feed_forward(ff1_weight, ff1_bias, ff2_weight, ff2_bias,
                         *, tile_s=None, tile_f=None):
    """Mirrors TtFeedForwardModel.__init__/feed_forward(): transpose the Linear
    weights ONCE at init (no per-forward HBM transpose) and return forward()."""
    F, H = ff1_weight.shape
    w1t = jnp.transpose(ff1_weight)            # [H, F]
    w2t = jnp.transpose(ff2_weight)            # [F, H]
    b1 = ff1_bias.reshape(1, F)
    b2 = ff2_bias.reshape(1, H)

    def forward(activation):                   # activation: [B, 1, S, H]
        B, one, S, Hh = activation.shape
        assert one == 1 and Hh == H
        act3 = activation.reshape(B, S, H)
        out = _ffn_pallas(act3, w1t, b1, w2t, b2, tile_s, tile_f)
        return out.reshape(B, 1, S, H)

    return forward


def tt_feed_forward(activation, ff1_weight, ff1_bias, ff2_weight, ff2_bias):
    # One-shot convenience wrapper; prefer make_tt_feed_forward in a real model
    # so the weight transpose happens once at init.
    return make_tt_feed_forward(ff1_weight, ff1_bias, ff2_weight, ff2_bias)(activation)


def _reference(activation, ff1_weight, ff1_bias, ff2_weight, ff2_bias):
    x = activation.astype(jnp.float32)
    h = jnp.einsum("bosh,fh->bosf", x, ff1_weight.astype(jnp.float32)) + ff1_bias.astype(jnp.float32)
    h = jax.nn.gelu(h, approximate=True)
    y = jnp.einsum("bosf,hf->bosh", h, ff2_weight.astype(jnp.float32)) + ff2_bias.astype(jnp.float32)
    return y


if __name__ == "__main__":
    # Small, tile-aligned shapes consistent with a BERT FFN block.
    B, S, H, F = 2, 256, 128, 512   # batch, seq, hidden, ffn(=4*hidden)

    key = jax.random.PRNGKey(0)
    k_act, k_w1, k_b1, k_w2, k_b2 = jax.random.split(key, 5)

    activation = jax.random.normal(k_act, (B, 1, S, H), dtype=jnp.float32).astype(jnp.bfloat16)
    ff1_weight = (jax.random.normal(k_w1, (F, H), dtype=jnp.float32) * 0.05).astype(jnp.bfloat16)
    ff1_bias = (jax.random.normal(k_b1, (F,), dtype=jnp.float32) * 0.05).astype(jnp.bfloat16)
    ff2_weight = (jax.random.normal(k_w2, (H, F), dtype=jnp.float32) * 0.05).astype(jnp.bfloat16)
    ff2_bias = (jax.random.normal(k_b2, (H,), dtype=jnp.float32) * 0.05).astype(jnp.bfloat16)

    # Force multi-step tiles in the small test (tile_s=128, tile_f=256) so both the
    # sequence tiling and the F-accumulation paths are exercised: grid = (2, 2, 2).
    ffn = make_tt_feed_forward(ff1_weight, ff1_bias, ff2_weight, ff2_bias,
                               tile_s=128, tile_f=256)
    out = jax.block_until_ready(ffn(activation))

    ref = _reference(activation, ff1_weight, ff1_bias, ff2_weight, ff2_bias)
    err = jnp.max(jnp.abs(out.astype(jnp.float32) - ref))
    assert out.shape == (B, 1, S, H)
    assert err < 5e-2, f"max abs err {err}"

    print("KERNEL_OK")
</pallas_src>

<mosaic_0001>
module attributes {stable_mosaic.version = 11 : i64} {
  func.func @_ffn_kernel(%arg0: i32, %arg1: i32, %arg2: i32, %arg3: memref<1x128x128xbf16, #tpu.memory_space<vmem>>, %arg4: memref<128x256xbf16, #tpu.memory_space<vmem>>, %arg5: memref<1x256xbf16, #tpu.memory_space<vmem>>, %arg6: memref<256x128xbf16, #tpu.memory_space<vmem>>, %arg7: memref<1x128xbf16, #tpu.memory_space<vmem>>, %arg8: memref<1x128x128xbf16, #tpu.memory_space<vmem>>, %arg9: memref<128x128xf32, #tpu.memory_space<vmem>>) attributes {dimension_semantics = [#tpu.dimension_semantics<parallel>, #tpu.dimension_semantics<parallel>, #tpu.dimension_semantics<arbitrary>], iteration_bounds = array<i64: 2, 2, 2>, scalar_prefetch = 0 : i64, scratch_operands = 1 : i64, tpu.core_type = #tpu.core_type<tc>, window_params = [{transform_indices = @transform_0, window_bounds = array<i64: 1, 128, 128>}, {transform_indices = @transform_1, window_bounds = array<i64: 128, 256>}, {transform_indices = @transform_2, window_bounds = array<i64: 1, 256>}, {transform_indices = @transform_3, window_bounds = array<i64: 256, 128>}, {pipeline_mode = #tpu.pipeline_mode<synchronous>, transform_indices = @transform_4, window_bounds = array<i64: 1, 128>}, {transform_indices = @transform_5, window_bounds = array<i64: 1, 128, 128>}]} {
    %c0_i32 = arith.constant 0 : i32
    %0 = arith.cmpi eq, %arg2, %c0_i32 : i32
    %1 = arith.extui %0 : i1 to i32
    %c0_i32_0 = arith.constant 0 : i32
    %2 = arith.cmpi ne, %1, %c0_i32_0 : i32
    scf.if %2 {
      %c0_19 = arith.constant 0 : index
      %c0_20 = arith.constant 0 : index
      %33 = vector.load %arg7[%c0_19, %c0_20] : memref<1x128xbf16, #tpu.memory_space<vmem>>, vector<1x128xbf16>
      %34 = arith.extf %33 : vector<1x128xbf16> to vector<1x128xf32>
      %35 = vector.shape_cast %34 : vector<1x128xf32> to vector<1x128xf32>
      %36 = vector.broadcast %35 : vector<1x128xf32> to vector<128x128xf32>
      %c0_21 = arith.constant 0 : index
      %c0_22 = arith.constant 0 : index
      %37 = vector.load %arg9[%c0_21, %c0_22] : memref<128x128xf32, #tpu.memory_space<vmem>>, vector<128x128xf32>
      tpu.vector_store %arg9[%c0_21, %c0_22], %36 {strides = array<i32>} : memref<128x128xf32, #tpu.memory_space<vmem>>, vector<128x128xf32>,
    } else {
    }
    %c0 = arith.constant 0 : index
    %c0_1 = arith.constant 0 : index
    %c0_2 = arith.constant 0 : index
    %3 = vector.load %arg3[%c0, %c0_1, %c0_2] : memref<1x128x128xbf16, #tpu.memory_space<vmem>>, vector<1x128x128xbf16>
    %4 = vector.shape_cast %3 : vector<1x128x128xbf16> to vector<128x128xbf16>
    %c0_3 = arith.constant 0 : index
    %c0_4 = arith.constant 0 : index
    %5 = vector.load %arg4[%c0_3, %c0_4] : memref<128x256xbf16, #tpu.memory_space<vmem>>, vector<128x256xbf16>
    %cst = arith.constant dense<0.000000e+00> : vector<128x256xf32>
    %6 = tpu.matmul %4, %5, %cst {dimension_numbers = #tpu.dot_dimension_numbers<[1], [0], [0], [1], [0, 0, 1, 1], [], []>} : vector<128x128xbf16>, vector<128x256xbf16>, vector<128x256xf32> -> vector<128x256xf32>
    %c0_5 = arith.constant 0 : index
    %c0_6 = arith.constant 0 : index
    %7 = vector.load %arg5[%c0_5, %c0_6] : memref<1x256xbf16, #tpu.memory_space<vmem>>, vector<1x256xbf16>
    %8 = arith.extf %7 : vector<1x256xbf16> to vector<1x256xf32>
    %9 = vector.broadcast %8 : vector<1x256xf32> to vector<128x256xf32>
    %10 = arith.addf %6, %9 : vector<128x256xf32>
    %11 = arith.mulf %10, %10 : vector<128x256xf32>
    %12 = arith.mulf %10, %11 : vector<128x256xf32>
    %cst_7 = arith.constant 4.471500e-02 : f32
    %13 = vector.broadcast %cst_7 : f32 to vector<128x256xf32>
    %14 = arith.mulf %13, %12 : vector<128x256xf32>
    %15 = arith.addf %10, %14 : vector<128x256xf32>
    %cst_8 = arith.constant 0.797884583 : f32
    %16 = vector.broadcast %cst_8 : f32 to vector<128x256xf32>
    %17 = arith.mulf %16, %15 : vector<128x256xf32>
    %18 = math.tanh %17 : vector<128x256xf32>
    %cst_9 = arith.constant 1.000000e+00 : f32
    %19 = vector.broadcast %cst_9 : f32 to vector<128x256xf32>
    %20 = arith.addf %19, %18 : vector<128x256xf32>
    %cst_10 = arith.constant 5.000000e-01 : f32
    %21 = vector.broadcast %cst_10 : f32 to vector<128x256xf32>
    %22 = arith.mulf %21, %20 : vector<128x256xf32>
    %23 = arith.mulf %10, %22 : vector<128x256xf32>
    %24 = arith.truncf %23 : vector<128x256xf32> to vector<128x256xbf16>
    %c0_11 = arith.constant 0 : index
    %c0_12 = arith.constant 0 : index
    %25 = vector.load %arg9[%c0_11, %c0_12] : memref<128x128xf32, #tpu.memory_space<vmem>>, vector<128x128xf32>
    %c0_13 = arith.constant 0 : index
    %c0_14 = arith.constant 0 : index
    %26 = vector.load %arg6[%c0_13, %c0_14] : memref<256x128xbf16, #tpu.memory_space<vmem>>, vector<256x128xbf16>
    %cst_15 = arith.constant dense<0.000000e+00> : vector<128x128xf32>
    %27 = tpu.matmul %24, %26, %cst_15 {dimension_numbers = #tpu.dot_dimension_numbers<[1], [0], [0], [1], [0, 0, 1, 1], [], []>} : vector<128x256xbf16>, vector<256x128xbf16>, vector<128x128xf32> -> vector<128x128xf32>
    %28 = arith.addf %25, %27 : vector<128x128xf32>
    %c0_16 = arith.constant 0 : index
    %c0_17 = arith.constant 0 : index
    %29 = vector.load %arg9[%c0_16, %c0_17] : memref<128x128xf32, #tpu.memory_space<vmem>>, vector<128x128xf32>
    tpu.vector_store %arg9[%c0_16, %c0_17], %28 {strides = array<i32>} : memref<128x128xf32, #tpu.memory_space<vmem>>, vector<128x128xf32>,
    %c1_i32 = arith.constant 1 : i32
    %30 = arith.cmpi eq, %arg2, %c1_i32 : i32
    %31 = arith.extui %30 : i1 to i32
    %c0_i32_18 = arith.constant 0 : i32
    %32 = arith.cmpi ne, %31, %c0_i32_18 : i32
    scf.if %32 {
      %c0_19 = arith.constant 0 : index
      %c0_20 = arith.constant 0 : index
      %33 = vector.load %arg9[%c0_19, %c0_20] : memref<128x128xf32, #tpu.memory_space<vmem>>, vector<128x128xf32>
      %34 = arith.truncf %33 : vector<128x128xf32> to vector<128x128xbf16>
      %c0_21 = arith.constant 0 : index
      %c0_22 = arith.constant 0 : index
      %c0_23 = arith.constant 0 : index
      %35 = vector.load %arg8[%c0_21, %c0_22, %c0_23] : memref<1x128x128xbf16, #tpu.memory_space<vmem>>, vector<1x128x128xbf16>
      %36 = vector.shape_cast %35 : vector<1x128x128xbf16> to vector<128x128xbf16>
      %37 = vector.shape_cast %34 : vector<128x128xbf16> to vector<1x128x128xbf16>
      tpu.vector_store %arg8[%c0_21, %c0_22, %c0_23], %37 {strides = array<i32>} : memref<1x128x128xbf16, #tpu.memory_space<vmem>>, vector<1x128x128xbf16>,
    } else {
    }
    return
  }
  func.func @transform_0(%arg0: i32, %arg1: i32, %arg2: i32) -> (i32, i32, i32) {
    %c0_i32 = arith.constant 0 : i32
    %c0_i32_0 = arith.constant 0 : i32
    return %arg0, %arg1, %c0_i32 : i32, i32, i32
  }
  func.func @transform_1(%arg0: i32, %arg1: i32, %arg2: i32) -> (i32, i32) {
    %c0_i32 = arith.constant 0 : i32
    %c0_i32_0 = arith.constant 0 : i32
    return %c0_i32, %arg2 : i32, i32
  }
  func.func @transform_2(%arg0: i32, %arg1: i32, %arg2: i32) -> (i32, i32) {
    %c0_i32 = arith.constant 0 : i32
    %c0_i32_0 = arith.constant 0 : i32
    return %c0_i32, %arg2 : i32, i32
  }
  func.func @transform_3(%arg0: i32, %arg1: i32, %arg2: i32) -> (i32, i32) {
    %c0_i32 = arith.constant 0 : i32
    %c0_i32_0 = arith.constant 0 : i32
    return %arg2, %c0_i32 : i32, i32
  }
  func.func @transform_4(%arg0: i32, %arg1: i32, %arg2: i32) -> (i32, i32) {
    %c0_i32 = arith.constant 0 : i32
    %c0_i32_0 = arith.constant 0 : i32
    %c0_i32_1 = arith.constant 0 : i32
    return %c0_i32, %c0_i32_0 : i32, i32
  }
  func.func @transform_5(%arg0: i32, %arg1: i32, %arg2: i32) -> (i32, i32, i32) {
    %c0_i32 = arith.constant 0 : i32
    %c0_i32_0 = arith.constant 0 : i32
    return %arg0, %arg1, %c0_i32 : i32, i32, i32
  }
}

</mosaic_0001>

<bundles_post_ra>
// kernel: tpu_custom_call.1
= control target key start
LH: loop header
LB: loop body
LE: loop exit
PB: predicated region body
PF: predicated region fallthrough
CT: control target
= control target key end

     0   :  { %s3056_s0 = inlined_call_operand.hbm [shape: bf16[2,256,128], index: 0, kind: input, shape index: {}]   ;;  %s3057_s1 = inlined_call_operand.hbm [shape: bf16[128,512], index: 1, kind: input, shape index: {}]   ;;  %s3058_s2 = inlined_call_operand.vmem [shape: bf16[1,512], index: 2, kind: input, shape index: {}]   ;;  %s3059_s3 = inlined_call_operand.hbm [shape: bf16[512,128], index: 3, kind: input, shape index: {}]   ;;  %s3060_s4 = inlined_call_operand.vmem [shape: bf16[1,128], index: 4, kind: input, shape index: {}]   ;;  %s3061_s5 = inlined_call_operand.hbm [shape: bf16[2,256,128], index: 5, kind: output, shape index: {}]  }
   0x1   :  { %3080 = sst [smem:[#allocation25_spill]] %s3057_s1 }
   0x2   :  { %3081 = sst [smem:[#allocation26_spill]] %s3058_s2 }
   0x3   :  { %3082 = sst [smem:[#allocation27_spill]] %s3060_s4 }
   0x4   :  { %3083 = sst [smem:[#allocation28_spill]] %s3061_s5 }
   0x5   :  { %10 = vsyncpa [#allocation4], 0 }
   0x6   :  { %12 = vsyncpa [#allocation4 + $0x1], 0 }
   0x7   :  { %13 = vsyncpa [#allocation7], 0 }
   0x8   :  { %15 = vsyncpa [#allocation7 + $0x1], 0 }
   0x9   :  { %16 = vsyncpa [#allocation5], 0 }
   0xa   :  { %18 = vsyncpa [#allocation5 + $0x1], 0  ;;  %s2267_s18 = smov 0   ;;  %s2269_s19 = smov 0  }
   0xb   :  { %s2271_s20 = smov 0   ;;  %s2273_s21 = smov 0  }
   0xc   :  { %s2275_s22 = smov 0   ;;  %s2277_s23 = smov 0  }
   0xd   :  { %s2279_s24 = smov 0   ;;  %s2281_s25 = smov 0  }
   0xe   :  { %s2283_s26 = smov 0   ;;  %s2285_s27 = smov 0  }
   0xf   :  { %s2287_s28 = smov 0   ;;  %s2289_s29 = smov 0  }
  0x10   :  { %s2291_s30 = smov 0  }
  0x11 LB: > { %3084 = sst [smem:[#allocation13_spill]] %s2179_s19  ;;  %s36_s6 = sadd.s32 1, %s2211_s27  ;;  %s2223_s30 = sphi %s2291_s30, %s24_s30   ;;  %s2219_s29 = sphi %s2289_s29, %s3144_s29   ;;  %s2215_s28 = sphi %s2287_s28, %s3143_s28   ;;  %s2211_s27 = sphi %s2285_s27, %s3142_s27   ;;  %s2207_s26 = sphi %s2283_s26, %s3141_s26   ;;  %s2203_s25 = sphi %s2281_s25, %s3140_s25   ;;  %s2199_s24 = sphi %s2279_s24, %s3139_s24   ;;  %s2195_s23 = sphi %s2277_s23, %s3138_s23   ;;  %s2191_s22 = sphi %s2275_s22, %s3137_s22   ;;  %s2187_s21 = sphi %s2273_s21, %s3136_s21   ;;  %s2183_s20 = sphi %s2271_s20, %s3132_s20   ;;  %s2179_s19 = sphi %s2269_s19, %s3131_s19   ;;  %s2175_s18 = sphi %s2267_s18, %s3130_s18  }
  0x12   : > { %3085 = sst [smem:[#allocation14_spill]] %s2183_s20  ;;  %p3065_p0 = scmp.eq.s32.totalorder %s2223_s30, 0 }
  0x13   : > { %3086 = sst [smem:[#allocation15_spill]] %s2187_s21  ;;  %p2334_p1 = scmp.ge.s32.totalorder %s36_s6, 2 }
  0x14   : > { %3087 = sst [smem:[#allocation16_spill]] %s2199_s24  ;;  %s78_s8 = sadd.s32 1, %s2183_s20 }
  0x15   : > { %3088 = sst [smem:[#allocation17_spill]] %s2203_s25  ;;  %p85_p2 = scmp.ne.s32.totalorder %s2183_s20, %s2179_s19 }
  0x16   : > { %3089 = sst [smem:[#allocation18_spill]] %s2207_s26  ;;  %s3146_s6 = smov (%p2334_p1, %s36_s6), 0 }
  0x17   : > { %3091 = sst [smem:[#allocation19_spill]] %s3146_s6  ;;  %p87_p4 = por %p85_p2, %p3065_p0 }
  0x18   : > { %s75_s9 = ssub.s32 %s2211_s27, %s3146_s6  ;;  %p3064_p5 = scmp.lt.s32.totalorder %s2223_s30, 8 }
  0x19   : > { %p76_p6 = scmp.eq.s32.totalorder %s75_s9, 0  ;;  %s242_s10 = sand.u32 1, %s2223_s30  }
  0x1a   : > { %s244_s11 = sand.u32 1, %s2183_s20   ;;  %s1614_s14 = sshll.u32 %s2211_s27, 7 }
  0x1b   : > { %s2355_s12 = scalar_select %p76_p6, %s2183_s20, %s78_s8  }
  0x1c   : > { %s2357_s13 = sshll.u32 %s244_s11, 7  ;;  %s3093_s1 = sld [smem:[#allocation25_spill]] }
  0x1d   : > { %3092 = sst [smem:[#allocation20_spill]] %s2355_s12  ;;  %s246_s6 = scalar_lea.vmem [#allocation6], %s2357_s13 }
  0x1e   : > { %s253_s5 = sshll.u32 %s246_s6, 4  ;;  %p2368_p7 = pnand %p3064_p5, %p87_p4  ;;  %s2372_s5 = int_to_ptr.vmem [resolvable:$true] %s253_s5 }
  0x1f   : > { %s2375_s8 = scalar_lea.sflag [#allocation7], %s242_s10 }
  0x20   : > { %p3066_p10 = pneg %p2368_p7 }
  0x22   : > { %s2363_s17 = scalar_lea.hbm %s3093_s1, %s1614_s14  ;;  %s1996_s15 = scalar_lea.hbm %s3093_s1, 4096 }
  0x23   : > { %s1991_s11 = scalar_lea.hbm %s2363_s17, 2048  ;;  %p1997_p13 = scmp.lt.u32.totalorder %s2363_s17, %s3093_s1 }
  0x24   : > { %p1992_p9 = scmp.ne.s32.totalorder %s2363_s17, %s1991_s11  ;;  %p1998_p2 = scmp.lt.u32.totalorder %s1996_s15, %s1991_s11 }
  0x25   : > { %p2000_p6 = scmp.lt.u32.totalorder %s1991_s11, %s2363_s17 }
  0x26   : > { %p1994_p11 = pnand %p3066_p10, %p1992_p9  ;;  %p1999_p4 = por %p1998_p2, %p1997_p13 }
  0x28   : > { %p1995_p12 = pneg %p1994_p11  ;;  %p2001_p5 = por %p2000_p6, %p1999_p4 }
  0x2a   : > { %p2002_p3 = pnand %p2001_p5, %p1995_p12 }
  0x2c   : > { %2005 = shalt.err (!%p2002_p3)
}
  0x2d   : > { %s2006_s10 = scalar_lea.vmem %s2372_s5, 2048  ;;  %s2225_s6 = smov [#allocation6]  }
  0x2e   : > { %p2007_p9 = scmp.ne.s32.totalorder %s2372_s5, %s2006_s10  ;;  %s2011_s14 = sshll.u32 %s2225_s6, 4  ;;  %s2012_s14 = int_to_ptr.vmem [resolvable:$false] %s2011_s14 }
  0x2f   : > { %s2013_s12 = scalar_lea.vmem %s2012_s14, 4096  ;;  %p2014_p8 = scmp.lt.s32.totalorder %s2372_s5, %s2012_s14 }
  0x30   : > { %p2009_p11 = pnand %p2007_p9, %p3066_p10  ;;  %p2015_p13 = scmp.lt.s32.totalorder %s2013_s12, %s2006_s10 }
  0x32   : > { %p2010_p0 = pneg %p2009_p11  ;;  %p2016_p2 = por %p2015_p13, %p2014_p8 }
  0x34   : > { %p2017_p4 = pnand %p2016_p2, %p2010_p0 }
  0x36   : > { %2020 = shalt.err (!%p2017_p4)
}
  0x37   : > { %s2226_s11 = smov 256   ;;  %s2227_s15 = smov 128  }
  0x38   : > { %s2228_s16 = smov 8   ;;  %p290_p0 = scmp.lt.s32.totalorder %s2223_s30, 9 }
  0x39   : > { %1757 = dma.hbm_to_vmem [thread:$0]  (!%p2368_p7), %s2363_s17, 2048, %s2372_s5, %s2375_s8, %s2226_s11, %s2227_s15, %s2228_s16  }
  0x3a   : > { %p3095_p3 = scmp.ge.s32.totalorder %s2223_s30, 1  ;;  %s2411_s6 = sadd.s32 4294967295, %s2223_s30  }
  0x3b   : > { %s1531_s14 = sadd.s32 4294967294, %s2223_s30   ;;  %s39_s12 = sadd.s32 1, %s2215_s28 }
  0x3c   : > { %p2406_p5 = pnand %p3095_p3, %p290_p0  ;;  %s43_s1 = sadd.s32 1, %s2219_s29 }
  0x3d   : > { %s3148_s12 = smov (!%p2334_p1, %s39_s12), %s2215_s28  ;;  %s52_s5 = sadd.s32 1, %s2195_s23 }
  0x3e   : > { %s3096_s10 = scalar_select %p2406_p5, 1, 0 }
  0x3f   : > { %p59_p8 = scmp.ne.s32.totalorder %s2195_s23, %s2191_s22  ;;  %p41_p12 = scmp.ge.s32.totalorder %s3148_s12, 2 }
  0x40   : > { %p65_p6 = scmp.ne.s32.totalorder %s2191_s22, %s2187_s21  ;;  %p3097_p9 = scmp.eq.s32.totalorder %s2223_s30, 0 }
  0x41   : > { %p66_p13 = scmp.eq.s32.totalorder %s2411_s6, 0  ;;  %s3150_s12 = smov (%p41_p12, %s3148_s12), 0 }
  0x42   : > { %p2429_p11 = por %p3097_p9, %p59_p8  ;;  %3099 = sst [smem:[#allocation21_spill]] %s3150_s12 }
  0x43   : > { %s3152_s1 = smov (!%p41_p12, %s43_s1), %s2219_s29  ;;  %s48_s7 = ssub.s32 %s2215_s28, %s3150_s12 }
  0x44   : > { %p2442_p1 = por %p66_p13, %p65_p6  ;;  %p45_p2 = scmp.ge.s32.totalorder %s3152_s1, 2 }
  0x45   : > { %p3101_p4 = scmp.ne.s32.totalorder %s2179_s19, %s2175_s18  ;;  %p190_p3 = scmp.eq.s32.totalorder %s2411_s6, 7 }
  0x46   : > { %s3100_s11 = scalar_select %p2442_p1, 1, 0 }
  0x47   : > { %p2449_p0 = por %p3101_p4, %p66_p13  ;;  %p196_p9 = scmp.eq.s32.totalorder %s1531_s14, 7 }
  0x48   : > { %s3154_s1 = smov (%p45_p2, %s3152_s1), 0  ;;  %p2459_p12 = por %p190_p3, %p59_p8 }
  0x49   : > { %s3102_s15 = scalar_select %p2449_p0, 1, 0 }
  0x4a   : > { %3104 = sst [smem:[#allocation23_spill]] %s3154_s1  ;;  %p2466_p10 = por %p196_p9, %p65_p6 }
  0x4b   : > { %3103 = sst [smem:[#allocation22_spill]] %s3102_s15  ;;  %s47_s18 = ssub.s32 %s2219_s29, %s3154_s1 }
  0x4c   : > { %s3105_s16 = scalar_select %p2459_p12, 1, 0 }
  0x4d   : > { %s3107_s12 = scalar_select %p2466_p10, 1, 0 }
  0x4e   : > { %3106 = sst [smem:[#allocation24_spill]] %s3105_s16  ;;  %s219_s20 = sand.u32 1, %s2195_s23  }
  0x4f   : > { %s49_s26 = sor.u32 %s48_s7, %s47_s18  ;;  %s1534_s14 = sshll.u32 %s219_s20, 6 }
  0x50   : > { %p50_p13 = scmp.eq.s32.totalorder %s49_s26, 0  ;;  %s1535_s25 = sshll.u32 %s2215_s28, 4 }
  0x51   : > { %s1536_s2 = sshll.u32 %s2219_s29, 5  ;;  %s223_s24 = scalar_lea.vmem [#allocation3], %s1534_s14 }
  0x52   : > { %s2475_s4 = scalar_select %p50_p13, %s2195_s23, %s52_s5  }
  0x53   : > { %s232_s15 = sshll.u32 %s223_s24, 4  ;;  %s229_s19 = sadd.s32 %s1536_s2, %s1535_s25  ;;  %s2478_s15 = int_to_ptr.vmem [resolvable:$true] %s232_s15 }
  0x54   : > { %s1537_s16 = sshll.u32 %s229_s19, 6  ;;  %p3108_p8 = scmp.lt.s32.totalorder %s2223_s30, 8 }
  0x55   : > { %s2491_s26 = scalar_lea.hbm %s3056_s0, %s1537_s16  ;;  %s2493_s2 = scalar_lea.sflag [#allocation4], %s219_s20 }
  0x56   : > { %p2484_p6 = pnand %p3108_p8, %p2429_p11  ;;  %s2021_s19 = scalar_lea.hbm %s2491_s26, 1024 }
  0x57   : > { %p2022_p2 = scmp.ne.s32.totalorder %s2491_s26, %s2021_s19  ;;  %s2026_s25 = scalar_lea.hbm %s3056_s0, 4096 }
  0x58   : > { %p2023_p11 = pneg %p2484_p6  ;;  %p2027_p9 = scmp.lt.u32.totalorder %s2491_s26, %s3056_s0 }
  0x59   : > { %p2028_p13 = scmp.lt.u32.totalorder %s2026_s25, %s2021_s19  ;;  %p2030_p10 = scmp.lt.u32.totalorder %s2021_s19, %s2491_s26 }
  0x5a   : > { %p2024_p4 = pnand %p2023_p11, %p2022_p2 }
  0x5b   : > { %p2029_p8 = por %p2028_p13, %p2027_p9 }
  0x5c   : > { %p2025_p3 = pneg %p2024_p4 }
  0x5d   : > { %p2031_p12 = por %p2030_p10, %p2029_p8 }
  0x5f   : > { %p2032_p0 = pnand %p2031_p12, %p2025_p3 }
  0x61   : > { %2035 = shalt.err (!%p2032_p0)
}
  0x62   : > { %s2036_s20 = scalar_lea.vmem %s2478_s15, 1024  ;;  %s2229_s16 = smov [#allocation3]  }
  0x63   : > { %p2037_p2 = scmp.ne.s32.totalorder %s2478_s15, %s2036_s20  ;;  %s2041_s18 = sshll.u32 %s2229_s16, 4  ;;  %s2042_s18 = int_to_ptr.vmem [resolvable:$false] %s2041_s18 }
  0x64   : > { %s2043_s14 = scalar_lea.vmem %s2042_s18, 2048  ;;  %p2044_p5 = scmp.lt.s32.totalorder %s2478_s15, %s2042_s18 }
  0x65   : > { %p2039_p4 = pnand %p2037_p2, %p2023_p11  ;;  %p2045_p9 = scmp.lt.s32.totalorder %s2043_s14, %s2036_s20 }
  0x67   : > { %p2040_p1 = pneg %p2039_p4  ;;  %p2046_p13 = por %p2045_p9, %p2044_p5 }
  0x69   : > { %p2047_p10 = pnand %p2046_p13, %p2040_p1 }
  0x6b   : > { %2050 = shalt.err (!%p2047_p10)
}
  0x6c   : > { %s2230_s7 = smov 64   ;;  %s2231_s19 = smov 4  }
  0x6d   : > { %1754 = dma.hbm_to_vmem [thread:$0]  (!%p2484_p6), %s2491_s26, 1024, %s2478_s15, %s2493_s2, %s2230_s7, %s2230_s7, %s2231_s19  }
  0x6e   : > { %s1615_s24 = sshll.u32 %s2211_s27, 11  ;;  %s275_s17 = scalar_lea.vmem [#allocation8], %s2357_s13 }
  0x6f   : > { %s2528_s5 = scalar_lea.hbm %s3059_s3, %s1615_s24  ;;  %s282_s20 = sshll.u32 %s275_s17, 4  ;;  %s2531_s20 = int_to_ptr.vmem [resolvable:$true] %s282_s20 }
  0x70   : > { %s2051_s16 = scalar_lea.hbm %s2528_s5, 2048  ;;  %p3110_p1 = pneg %p2368_p7 }
  0x71   : > { %p2052_p5 = scmp.ne.s32.totalorder %s2528_s5, %s2051_s16  ;;  %s2056_s26 = scalar_lea.hbm %s3059_s3, 4096 }
  0x72   : > { %p2057_p6 = scmp.lt.u32.totalorder %s2528_s5, %s3059_s3  ;;  %p2058_p11 = scmp.lt.u32.totalorder %s2056_s26, %s2051_s16 }
  0x73   : > { %p2054_p0 = pnand %p2052_p5, %p3110_p1  ;;  %p2060_p8 = scmp.lt.u32.totalorder %s2051_s16, %s2528_s5 }
  0x74   : > { %p2059_p3 = por %p2058_p11, %p2057_p6 }
  0x75   : > { %p2055_p12 = pneg %p2054_p0 }
  0x76   : > { %p2061_p2 = por %p2060_p8, %p2059_p3 }
  0x78   : > { %p2062_p4 = pnand %p2061_p2, %p2055_p12 }
  0x7a   : > { %2065 = shalt.err (!%p2062_p4)
}
  0x7b   : > { %s2066_s13 = scalar_lea.vmem %s2531_s20, 2048  ;;  %p3111_p13 = pmov %p3110_p1 }
  0x7c   : > { %p2067_p9 = scmp.ne.s32.totalorder %s2531_s20, %s2066_s13  ;;  %s2232_s14 = smov [#allocation8]  }
  0x7d   : > { %s2071_s24 = sshll.u32 %s2232_s14, 4  ;;  %s2072_s24 = int_to_ptr.vmem [resolvable:$false] %s2071_s24 }
  0x7e   : > { %p2069_p10 = pnand %p2067_p9, %p3111_p13  ;;  %s2073_s1 = scalar_lea.vmem %s2072_s24, 4096 }
  0x7f   : > { %p2074_p1 = scmp.lt.s32.totalorder %s2531_s20, %s2072_s24  ;;  %p2075_p0 = scmp.lt.s32.totalorder %s2073_s1, %s2066_s13 }
  0x80   : > { %p2070_p5 = pneg %p2069_p10 }
  0x81   : > { %p2076_p6 = por %p2075_p0, %p2074_p1 }
  0x83   : > { %p2077_p11 = pnand %p2076_p6, %p2070_p5 }
  0x85   : > { %2080 = shalt.err (!%p2077_p11)
}
  0x86   : > { %1760 = dma.hbm_to_vmem [thread:$0]  (!%p2368_p7), %s2528_s5, 2048, %s2531_s20, %s2375_s8, %s2230_s7, %s2230_s7, %s2231_s19  }
  0x87   : > { %p3112_p12 = scmp.ne.s32.totalorder %s3096_s10, 0 }
  0x88   : > { %s2563_s25 = sand.u32 (!%p3112_p12), 1, %s2191_s22   ;;  %p3113_p3 = scmp.ne.s32.totalorder (!%p3112_p12), %s3100_s11, 0 }
  0x89   : > { %294 = sbr.rel (%p3112_p12) target bundleno = 795 (0x31b), region = 40  ;;  %s1545_s17 = sshll.u32 (!%p3112_p12), %s2563_s25, 6 }
  0x8a   : > { %s297_s16 = scalar_lea.sflag (!%p3112_p12), [#allocation4], %s2563_s25  ;;  %s2567_s21 = scalar_lea.vmem (!%p3112_p12), [#allocation3], %s1545_s17 }
  0x90   : > { %2162 = dma.done.wait (%p3113_p3), %s297_s16, 1024  }
  0x91   : > { %2164 = vsyncadd (%p3113_p3), %s297_s16, 4294966272  ;;  %s3114_s9 = sld [smem:[#allocation13_spill]]  ;;  %s3115_s8 = sld [smem:[#allocation22_spill]] }
  0x92   : > { %s305_s10 = sand.u32 1, %s2411_s6  }
  0x93   : > { %s306_s5 = scalar_lea.sflag [#allocation7], %s305_s10 }
  0x97   : > { %s307_s7 = sand.u32 1, %s3114_s9   ;;  %p3116_p7 = scmp.ne.s32.totalorder %s3115_s8, 0 }
  0x98   : > { %s1546_s19 = sshll.u32 %s307_s7, 7 }
  0x99   : > { %s2575_s20 = scalar_lea.vmem [#allocation6], %s1546_s19 }
  0x9a   : > { %2166 = dma.done.wait (%p3116_p7), %s306_s5, 4096  }
  0x9b   : > { %2168 = vsyncadd (%p3116_p7), %s306_s5, 4294963200  ;;  %s3117_s15 = sld [smem:[#allocation16_spill]]  ;;  %s3118_s18 = sld [smem:[#allocation26_spill]] }
  0x9c   : > { %s2588_s13 = scalar_lea.vmem [#allocation8], %s1546_s19  ;;  %s2590_s14 = scalar_lea.vmem [#allocation9], %s1545_s17 }
  0xa1   : > { %s1549_s26 = sshll.u32 %s3117_s15, 1  ;;  %p1550_p2 = scmp.ne.s32.totalorder %s3117_s15, 0 }
  0xa2   : > { %p362_p8 = scmp.lt.s32.totalorder %s1549_s26, 3  ;;  %s3119_s16 = sld [smem:[#allocation27_spill]] (!%p1550_p2)  ;;  %v375_v1 = vlaneseq (!%p1550_p2) }
  0xa3   : > { %372 = sbr.rel (%p1550_p2) target bundleno = 181 (0xb5), region = 56 }
  0xa4   : > { %s3156_s26 = smov (!%p362_p8, %s1549_s26), 3  ;;  %v376_v3 = vshrl.u32 (!%p1550_p2), %v375_v1, 7 }
  0xa5   : > { %s364_s6 = scalar_lea.vmem %s3118_s18, %s3156_s26 }
  0xa6   : > { %v377_v4 = vsub.s32 (!%p1550_p2), 0, %v376_v3 }
  0xa8   : > { %v373_v0 = vld [vmem:[%s3119_s16] sm:$0x1] (!%p1550_p2) }
  0xa9   : > { %v374_v2 = vunpack.c.l.bf16 (!%p1550_p2), %v373_v0 }
  0xab   : > { %v378_v5 = vrot.slane %v374_v2, %v377_v4 }
  0xad   : > { %379 = vst [vmem:[#allocation2] sm:$0xff] %v378_v5  ;;  %380 = vst [vmem:[#allocation2 + $0x8] sm:$0xff] %v378_v5 }
  0xae   : > { %381 = vst [vmem:[#allocation2 + $0x10] sm:$0xff] %v378_v5  ;;  %382 = vst [vmem:[#allocation2 + $0x18] sm:$0xff] %v378_v5 }
  0xaf   : > { %383 = vst [vmem:[#allocation2 + $0x20] sm:$0xff] %v378_v5  ;;  %384 = vst [vmem:[#allocation2 + $0x28] sm:$0xff] %v378_v5 }
  0xb0   : > { %385 = vst [vmem:[#allocation2 + $0x30] sm:$0xff] %v378_v5  ;;  %386 = vst [vmem:[#allocation2 + $0x38] sm:$0xff] %v378_v5 }
  0xb1   : > { %387 = vst [vmem:[#allocation2 + $0x40] sm:$0xff] %v378_v5  ;;  %388 = vst [vmem:[#allocation2 + $0x48] sm:$0xff] %v378_v5 }
  0xb2   : > { %389 = vst [vmem:[#allocation2 + $0x50] sm:$0xff] %v378_v5  ;;  %390 = vst [vmem:[#allocation2 + $0x58] sm:$0xff] %v378_v5 }
  0xb3   : > { %391 = vst [vmem:[#allocation2 + $0x60] sm:$0xff] %v378_v5  ;;  %392 = vst [vmem:[#allocation2 + $0x68] sm:$0xff] %v378_v5 }
  0xb4   : > { %393 = vst [vmem:[#allocation2 + $0x70] sm:$0xff] %v378_v5  ;;  %394 = vst [vmem:[#allocation2 + $0x78] sm:$0xff] %v378_v5 }
  0xb5 PF: > { %v1879_v6 = vld [vmem:[%s2575_s20 + $0x4] ss:$8 sps:$4 sm:$0xff]   ;;  %v1881_v7 = vld [vmem:[%s2575_s20] ss:$8 sps:$4 sm:$0xff]   ;;  %v2233_v8 = vmov 0   ;;  %v1905_v25 = vld [vmem:[%s2567_s21 + $0x10] sm:$0xff]   ;;  %v430_v47 = vlaneseq }
  0xb6   : > { %608 = vmatprep.mubr.bf16.mxu0 %v2233_v8  ;;  %576 = vmatprep.subr.bf16.mxu0 %v1879_v6  ;;  %v1882_v9 = vld [vmem:[%s2575_s20 + $0x14] ss:$8 sps:$4 sm:$0xff]   ;;  %v1884_v10 = vld [vmem:[%s2575_s20 + $0x10] ss:$8 sps:$4 sm:$0xff]   ;;  %v1885_v11 = vld [vmem:[%s2575_s20 + $0x24] ss:$8 sps:$4 sm:$0xff]  }
  0xb7   : > { %577 = vmatpush1.bf16.msra.mxu0 %v1881_v7  ;;  %v1887_v12 = vld [vmem:[%s2575_s20 + $0x20] ss:$8 sps:$4 sm:$0xff]   ;;  %v1888_v13 = vld [vmem:[%s2575_s20 + $0x34] ss:$8 sps:$4 sm:$0xff]   ;;  %v1890_v14 = vld [vmem:[%s2575_s20 + $0x30] ss:$8 sps:$4 sm:$0xff]  }
  0xb8   : > { %578 = vmatprep.subr.bf16.mxu0 %v1882_v9  ;;  %v1891_v15 = vld [vmem:[%s2575_s20 + $0x44] ss:$8 sps:$4 sm:$0xff]   ;;  %v1893_v16 = vld [vmem:[%s2575_s20 + $0x40] ss:$8 sps:$4 sm:$0xff]   ;;  %v1894_v17 = vld [vmem:[%s2575_s20 + $0x54] ss:$8 sps:$4 sm:$0xff]  }
  0xb9   : > { %v1896_v18 = vld [vmem:[%s2575_s20 + $0x50] ss:$8 sps:$4 sm:$0xff]   ;;  %v1897_v19 = vld [vmem:[%s2575_s20 + $0x64] ss:$8 sps:$4 sm:$0xff]   ;;  %v1899_v20 = vld [vmem:[%s2575_s20 + $0x60] ss:$8 sps:$4 sm:$0xff]  }
  0xba   : > { %v1900_v21 = vld [vmem:[%s2575_s20 + $0x74] ss:$8 sps:$4 sm:$0xff]   ;;  %v1902_v22 = vld [vmem:[%s2575_s20 + $0x70] ss:$8 sps:$4 sm:$0xff]   ;;  %v1903_v23 = vld [vmem:[%s2567_s21] sm:$0xff]   ;;  %v431_v48 = vshrl.u32 %v430_v47, 7 }
  0xbb   : > { %579 = vmatpush1.bf16.msra.mxu0 %v1884_v10  ;;  %v1904_v24 = vld [vmem:[%s2567_s21 + $0x8] sm:$0xff]   ;;  %v1906_v26 = vld [vmem:[%s2567_s21 + $0x18] sm:$0xff]   ;;  %v1907_v27 = vld [vmem:[%s2567_s21 + $0x20] sm:$0xff]   ;;  %s3121_s8 = sld [smem:[#allocation16_spill]] }
  0xbc   : > { %580 = vmatprep.subr.bf16.mxu0 %v1885_v11  ;;  %v1908_v28 = vld [vmem:[%s2567_s21 + $0x28] sm:$0xff]   ;;  %v1909_v29 = vld [vmem:[%s2567_s21 + $0x30] sm:$0xff]   ;;  %v1910_v30 = vld [vmem:[%s2567_s21 + $0x38] sm:$0xff]   ;;  %v432_v51 = vsub.s32 0, %v431_v48  ;;  %v436_v52 = vsub.s32 2, %v431_v48 }
  0xbd   : > { %v1911_v31 = vld [vmem:[%s2588_s13 + $0x40] sm:$0xff]   ;;  %v1913_v33 = vld [vmem:[%s2588_s13 + $0x48] sm:$0xff]   ;;  %v1915_v35 = vld [vmem:[%s2588_s13 + $0x50] sm:$0xff]  }
  0xbe   : > { %v1912_v32 = vld [vmem:[%s2588_s13] sm:$0xff]   ;;  %1679 = vmatprep.subr.bf16.mxu1 %v1911_v31  ;;  %v1914_v34 = vld [vmem:[%s2588_s13 + $0x8] sm:$0xff]   ;;  %v1916_v36 = vld [vmem:[%s2588_s13 + $0x10] sm:$0xff]  }
  0xbf   : > { %581 = vmatpush1.bf16.msra.mxu0 %v1887_v12  ;;  %1680 = vmatpush3.bf16.msra.mxu1 %v1912_v32  ;;  %v1917_v37 = vld [vmem:[%s2588_s13 + $0x58] sm:$0xff]   ;;  %v1919_v39 = vld [vmem:[%s2588_s13 + $0x60] sm:$0xff]   ;;  %v1921_v41 = vld [vmem:[%s2588_s13 + $0x68] sm:$0xff]  }
  0xc0   : > { %582 = vmatprep.subr.bf16.mxu0 %v1888_v13  ;;  %1681 = vmatprep.subr.bf16.mxu1 %v1913_v33  ;;  %v1918_v38 = vld [vmem:[%s2588_s13 + $0x18] sm:$0xff]   ;;  %v1920_v40 = vld [vmem:[%s2588_s13 + $0x20] sm:$0xff]   ;;  %v1922_v42 = vld [vmem:[%s2588_s13 + $0x28] sm:$0xff]  }
  0xc1   : > { %v1923_v43 = vld [vmem:[%s2588_s13 + $0x70] sm:$0xff]   ;;  %v1925_v45 = vld [vmem:[%s2588_s13 + $0x78] sm:$0xff]   ;;  %v427_v49 = vld [vmem:[%s364_s6] sm:$0x3]  ;;  %p1591_p4 = scmp.ne.s32.totalorder %s3121_s8, 1 }
  0xc2   : > { %v1924_v44 = vld [vmem:[%s2588_s13 + $0x30] sm:$0xff]   ;;  %v1926_v46 = vld [vmem:[%s2588_s13 + $0x38] sm:$0xff]   ;;  %v428_v50 = vunpack.c.l.bf16 %v427_v49 }
  0xc3   : > { %583 = vmatpush1.bf16.msra.mxu0 %v1890_v14  ;;  %1682 = vmatpush3.bf16.msra.mxu1 %v1914_v34 }
  0xc4   : > { %584 = vmatprep.subr.bf16.mxu0 %v1891_v15  ;;  %1683 = vmatprep.subr.bf16.mxu1 %v1915_v35  ;;  %v433_v53 = vrot.slane %v428_v50, %v432_v51  ;;  %v437_v54 = vrot.slane %v428_v50, %v436_v52 }
  0xc6   : > { %v2641_v55 = vrot.slane %v433_v53, %v432_v51  ;;  %v2643_v56 = vrot.slane %v437_v54, %v432_v51 }
  0xc7   : > { %585 = vmatpush1.bf16.msra.mxu0 %v1893_v16  ;;  %1684 = vmatpush3.bf16.msra.mxu1 %v1916_v36 }
  0xc8   : > { %586 = vmatprep.subr.bf16.mxu0 %v1894_v17  ;;  %1685 = vmatprep.subr.bf16.mxu1 %v1917_v37 }
  0xcb   : > { %587 = vmatpush1.bf16.msra.mxu0 %v1896_v18  ;;  %1686 = vmatpush3.bf16.msra.mxu1 %v1918_v38 }
  0xcc   : > { %588 = vmatprep.subr.bf16.mxu0 %v1897_v19  ;;  %1687 = vmatprep.subr.bf16.mxu1 %v1919_v39 }
  0xcf   : > { %589 = vmatpush1.bf16.msra.mxu0 %v1899_v20  ;;  %1688 = vmatpush3.bf16.msra.mxu1 %v1920_v40 }
  0xd0   : > { %590 = vmatprep.subr.bf16.mxu0 %v1900_v21  ;;  %1689 = vmatprep.subr.bf16.mxu1 %v1921_v41 }
  0xd3   : > { %591 = vmatpush1.bf16.msra.mxu0 %v1902_v22  ;;  %1690 = vmatpush3.bf16.msra.mxu1 %v1922_v42 }
  0xd4   : > { %1691 = vmatprep.subr.bf16.mxu1 %v1923_v43 }
  0xd6   : > { %609 = vmatmul.mubr.bf16.vlgmr.msra.gmra.mrb[0].mxu0 %v1903_v23 }
  0xd7   : > { %618 = vmatprep.mubr.bf16.mxu0 %v2233_v8  ;;  %1692 = vmatpush3.bf16.msra.mxu1 %v1924_v44 }
  0xd8   : > { %1693 = vmatprep.subr.bf16.mxu1 %v1925_v45 }
  0xdb   : > { %1694 = vmatpush3.bf16.msra.mxu1 %v1926_v46 }
  0xde   : > { %619 = vmatmul.mubr.bf16.gmra.mrb[4].mxu0 %v1904_v24 }
  0xdf   : > { %628 = vmatprep.mubr.bf16.mxu0 %v2233_v8 }
  0xe6   : > { %629 = vmatmul.mubr.bf16.gmra.mrb[8].mxu0 %v1905_v25 }
  0xe7   : > { %638 = vmatprep.mubr.bf16.mxu0 %v2233_v8 }
  0xee   : > { %639 = vmatmul.mubr.bf16.gmra.mrb[12].mxu0 %v1906_v26 }
  0xef   : > { %648 = vmatprep.mubr.bf16.mxu0 %v2233_v8 }
  0xf6   : > { %649 = vmatmul.mubr.bf16.gmra.mrb[16].mxu0 %v1907_v27 }
  0xf7   : > { %658 = vmatprep.mubr.bf16.mxu0 %v2233_v8 }
  0xfe   : > { %659 = vmatmul.mubr.bf16.gmra.mrb[20].mxu0 %v1908_v28 }
  0xff   : > { %668 = vmatprep.mubr.bf16.mxu0 %v2233_v8 }
 0x106   : > { %669 = vmatmul.mubr.bf16.gmra.mrb[24].mxu0 %v1909_v29 }
 0x107   : > { %678 = vmatprep.mubr.bf16.mxu0 %v2233_v8 }
 0x10e   : > { %679 = vmatmul.mubr.bf16.gmra.mrb[28].mxu0 %v1910_v30 }
 0x1a9   : > { %v610_v57 = vpop.f32.mrb[0].mxu0 }
 0x1aa   : > { %v2646_v58 = vadd.f32 %v610_v57, %v2641_v55  ;;  %v612_v59 = vpop.f32.mrb[1].mxu0 }
 0x1ab   : > { %v2649_v60 = vadd.f32 %v612_v59, %v2643_v56  ;;  %v614_v61 = vpop.f32.mrb[2].mxu0 }
 0x1ac   : > { %v689_v62 = vmul.f32 %v2646_v58, %v2646_v58  ;;  %v2654_v63 = vadd.f32 %v614_v61, %v2641_v55  ;;  %v616_v0 = vpop.f32.mrb[3].mxu0 }
 0x1ad   : > { %v690_v1 = vmul.f32 %v2649_v60, %v2649_v60  ;;  %v2659_v2 = vadd.f32 %v616_v0, %v2643_v56 }
 0x1ae   : > { %v721_v3 = vmul.f32 %v689_v62, %v2646_v58  ;;  %v691_v4 = vmul.f32 %v2654_v63, %v2654_v63 }
 0x1af   : > { %v722_v5 = vmul.f32 %v690_v1, %v2649_v60  ;;  %v692_v6 = vmul.f32 %v2659_v2, %v2659_v2 }
 0x1b0   : > { %v753_v7 = vmul.f32 0.044715, %v721_v3  ;;  %v723_v8 = vmul.f32 %v691_v4, %v2654_v63 }
 0x1b1   : > { %v754_v9 = vmul.f32 0.044715, %v722_v5  ;;  %v724_v10 = vmul.f32 %v692_v6, %v2659_v2  ;;  %v620_v11 = vpop.f32.mrb[4].mxu0 }
 0x1b2   : > { %v785_v12 = vadd.f32 %v753_v7, %v2646_v58  ;;  %v755_v13 = vmul.f32 0.044715, %v723_v8  ;;  %v2671_v14 = vadd.f32 %v620_v11, %v2641_v55  ;;  %v622_v15 = vpop.f32.mrb[5].mxu0 }
 0x1b3   : > { %v756_v16 = vmul.f32 0.044715, %v724_v10  ;;  %v2674_v17 = vadd.f32 %v622_v15, %v2643_v56  ;;  %v624_v18 = vpop.f32.mrb[6].mxu0  ;;  %v786_v19 = vadd.f32 %v754_v9, %v2649_v60 }
 0x1b4   : > { %v817_v20 = vmul.f32 0.7978846, %v785_v12  ;;  %v787_v21 = vadd.f32 %v755_v13, %v2654_v63  ;;  %v693_v22 = vmul.f32 %v2671_v14, %v2671_v14  ;;  %v2681_v23 = vadd.f32 %v624_v18, %v2641_v55  ;;  %v626_v24 = vpop.f32.mrb[7].mxu0 }
 0x1b5   : > { %v694_v25 = vmul.f32 %v2674_v17, %v2674_v17  ;;  %v2686_v26 = vadd.f32 %v626_v24, %v2643_v56  ;;  %v788_v27 = vadd.f32 %v756_v16, %v2659_v2  ;;  %v818_v28 = vmul.f32 0.7978846, %v786_v19 }
 0x1b6   : > { %1927 = vtanh.f32 %v817_v20  ;;  %v819_v29 = vmul.f32 0.7978846, %v787_v21  ;;  %v725_v30 = vmul.f32 %v693_v22, %v2671_v14  ;;  %v695_v31 = vmul.f32 %v2681_v23, %v2681_v23 }
 0x1b7   : > { %v726_v32 = vmul.f32 %v694_v25, %v2674_v17  ;;  %v696_v33 = vmul.f32 %v2686_v26, %v2686_v26  ;;  %v820_v34 = vmul.f32 0.7978846, %v788_v27  ;;  %1929 = vtanh.f32 %v818_v28 }
 0x1b8   : > { %1931 = vtanh.f32 %v819_v29  ;;  %v757_v35 = vmul.f32 0.044715, %v725_v30  ;;  %v727_v36 = vmul.f32 %v695_v31, %v2681_v23 }
 0x1b9   : > { %v758_v37 = vmul.f32 0.044715, %v726_v32  ;;  %v728_v38 = vmul.f32 %v696_v33, %v2686_v26  ;;  %v630_v39 = vpop.f32.mrb[8].mxu0  ;;  %1933 = vtanh.f32 %v820_v34 }
 0x1ba   : > { %v789_v40 = vadd.f32 %v757_v35, %v2671_v14  ;;  %v759_v41 = vmul.f32 0.044715, %v727_v36  ;;  %v2699_v42 = vadd.f32 %v630_v39, %v2641_v55  ;;  %v632_v43 = vpop.f32.mrb[9].mxu0 }
 0x1bb   : > { %v790_v44 = vadd.f32 %v758_v37, %v2674_v17  ;;  %v760_v45 = vmul.f32 0.044715, %v728_v38  ;;  %v2703_v46 = vadd.f32 %v632_v43, %v2643_v56  ;;  %v634_v47 = vpop.f32.mrb[10].mxu0 }
 0x1bc   : > { %v821_v48 = vmul.f32 0.7978846, %v789_v40  ;;  %v791_v49 = vadd.f32 %v759_v41, %v2681_v23  ;;  %v697_v50 = vmul.f32 %v2699_v42, %v2699_v42  ;;  %v2709_v51 = vadd.f32 %v634_v47, %v2641_v55  ;;  %v636_v52 = vpop.f32.mrb[11].mxu0 }
 0x1bd   : > { %v822_v53 = vmul.f32 0.7978846, %v790_v44  ;;  %v792_v54 = vadd.f32 %v760_v45, %v2686_v26  ;;  %v698_v57 = vmul.f32 %v2703_v46, %v2703_v46  ;;  %v2715_v59 = vadd.f32 %v636_v52, %v2643_v56 }
 0x1be   : > { %1935 = vtanh.f32 %v821_v48  ;;  %v823_v61 = vmul.f32 0.7978846, %v791_v49  ;;  %v729_v62 = vmul.f32 %v697_v50, %v2699_v42  ;;  %v699_v0 = vmul.f32 %v2709_v51, %v2709_v51 }
 0x1bf   : > { %1937 = vtanh.f32 %v822_v53  ;;  %v824_v1 = vmul.f32 0.7978846, %v792_v54  ;;  %v730_v3 = vmul.f32 %v698_v57, %v2703_v46  ;;  %v700_v4 = vmul.f32 %v2715_v59, %v2715_v59 }
 0x1c0   : > { %v1928_v5 = vpop.eup %1927  ;;  %1939 = vtanh.f32 %v823_v61  ;;  %v761_v6 = vmul.f32 0.044715, %v729_v62  ;;  %v731_v7 = vmul.f32 %v699_v0, %v2709_v51 }
 0x1c1   : > { %v1930_v8 = vpop.eup %1929  ;;  %1941 = vtanh.f32 %v824_v1  ;;  %v762_v9 = vmul.f32 0.044715, %v730_v3  ;;  %v732_v10 = vmul.f32 %v700_v4, %v2715_v59  ;;  %v640_v11 = vpop.f32.mrb[12].mxu0  ;;  %v2725_v12 = vadd.f32 1.0, %v1928_v5 }
 0x1c2   : > { %v1932_v13 = vpop.eup %1931  ;;  %v793_v15 = vadd.f32 %v761_v6, %v2699_v42  ;;  %v763_v16 = vmul.f32 0.044715, %v731_v7  ;;  %v2729_v18 = vadd.f32 %v640_v11, %v2641_v55  ;;  %v642_v19 = vpop.f32.mrb[13].mxu0  ;;  %v882_v20 = vadd.f32 1.0, %v1930_v8 }
 0x1c3   : > { %v794_v21 = vadd.f32 %v762_v9, %v2703_v46  ;;  %v764_v22 = vmul.f32 0.044715, %v732_v10  ;;  %v2733_v24 = vadd.f32 %v642_v19, %v2643_v56  ;;  %v644_v25 = vpop.f32.mrb[14].mxu0  ;;  %v2735_v27 = vadd.f32 1.0, %v1932_v13  ;;  %v1934_v33 = vpop.eup %1933 }
 0x1c4   : > { %v825_v28 = vmul.f32 0.7978846, %v793_v15  ;;  %v795_v29 = vadd.f32 %v763_v16, %v2709_v51  ;;  %v701_v30 = vmul.f32 %v2729_v18, %v2729_v18  ;;  %v2741_v31 = vadd.f32 %v644_v25, %v2641_v55  ;;  %v646_v32 = vpop.f32.mrb[15].mxu0 }
 0x1c5   : > { %v826_v34 = vmul.f32 0.7978846, %v794_v21  ;;  %v796_v35 = vadd.f32 %v764_v22, %v2715_v59  ;;  %v702_v36 = vmul.f32 %v2733_v24, %v2733_v24  ;;  %v2747_v37 = vadd.f32 %v646_v32, %v2643_v56 }
 0x1c6   : > { %1943 = vtanh.f32 %v825_v28  ;;  %v827_v38 = vmul.f32 0.7978846, %v795_v29  ;;  %v733_v39 = vmul.f32 %v701_v30, %v2729_v18  ;;  %v703_v40 = vmul.f32 %v2741_v31, %v2741_v31 }
 0x1c7   : > { %1945 = vtanh.f32 %v826_v34  ;;  %v828_v41 = vmul.f32 0.7978846, %v796_v35  ;;  %v734_v43 = vmul.f32 %v702_v36, %v2733_v24  ;;  %v704_v44 = vmul.f32 %v2747_v37, %v2747_v37 }
 0x1c8   : > { %v2755_v45 = vpop.eup %1935  ;;  %1947 = vtanh.f32 %v827_v38  ;;  %v765_v47 = vmul.f32 0.044715, %v733_v39  ;;  %v735_v48 = vmul.f32 %v703_v40, %v2741_v31  ;;  %v884_v49 = vadd.f32 1.0, %v1934_v33 }
 0x1c9   : > { %v2758_v50 = vpop.eup %1937  ;;  %1949 = vtanh.f32 %v828_v41  ;;  %v766_v52 = vmul.f32 0.044715, %v734_v43  ;;  %v736_v53 = vmul.f32 %v704_v44, %v2747_v37  ;;  %v650_v54 = vpop.f32.mrb[16].mxu0  ;;  %v914_v57 = vmul.f32 0.5, %v882_v20 }
 0x1ca   : > { %v2761_v61 = vpop.eup %1939  ;;  %v797_v62 = vadd.f32 %v765_v47, %v2729_v18  ;;  %v767_v0 = vmul.f32 0.044715, %v735_v48  ;;  %v2765_v1 = vadd.f32 %v650_v54, %v2641_v55  ;;  %v652_v3 = vpop.f32.mrb[17].mxu0  ;;  %v916_v4 = vmul.f32 0.5, %v884_v49 }
 0x1cb   : > { %v2767_v5 = vpop.eup %1941  ;;  %v798_v6 = vadd.f32 %v766_v52, %v2733_v24  ;;  %v768_v7 = vmul.f32 0.044715, %v736_v53  ;;  %v2771_v8 = vadd.f32 %v652_v3, %v2643_v56  ;;  %v654_v9 = vpop.f32.mrb[18].mxu0  ;;  %v946_v10 = vmul.f32 %v914_v57, %v2649_v60 }
 0x1cc   : > { %v829_v11 = vmul.f32 0.7978846, %v797_v62  ;;  %v799_v13 = vadd.f32 %v767_v0, %v2741_v31  ;;  %v705_v15 = vmul.f32 %v2765_v1, %v2765_v1  ;;  %v2778_v16 = vadd.f32 %v654_v9, %v2641_v55  ;;  %v656_v19 = vpop.f32.mrb[19].mxu0 }
 0x1cd   : > { %v830_v20 = vmul.f32 0.7978846, %v798_v6  ;;  %v800_v21 = vadd.f32 %v768_v7, %v2747_v37  ;;  %v706_v22 = vmul.f32 %v2771_v8, %v2771_v8  ;;  %v2784_v25 = vadd.f32 %v656_v19, %v2643_v56 }
 0x1ce   : > { %1951 = vtanh.f32 %v829_v11  ;;  %v831_v60 = vmul.f32 0.7978846, %v799_v13  ;;  %v737_v28 = vmul.f32 %v705_v15, %v2765_v1  ;;  %v707_v29 = vmul.f32 %v2778_v16, %v2778_v16 }
 0x1cf   : > { %1953 = vtanh.f32 %v830_v20  ;;  %v832_v30 = vmul.f32 0.7978846, %v800_v21  ;;  %v738_v32 = vmul.f32 %v706_v22, %v2771_v8  ;;  %v708_v33 = vmul.f32 %v2784_v25, %v2784_v25 }
 0x1d0   : > { %v2792_v34 = vpop.eup %1943  ;;  %1955 = vtanh.f32 %v831_v60  ;;  %v769_v35 = vmul.f32 0.044715, %v737_v28  ;;  %v739_v36 = vmul.f32 %v707_v29, %v2778_v16  ;;  %v948_v38 = vmul.f32 %v916_v4, %v2659_v2 }
 0x1d1   : > { %v2796_v39 = vpop.eup %1945  ;;  %1957 = vtanh.f32 %v832_v30  ;;  %v770_v40 = vmul.f32 0.044715, %v738_v32  ;;  %v740_v41 = vmul.f32 %v708_v33, %v2784_v25  ;;  %v913_v43 = vmul.f32 0.5, %v2725_v12  ;;  %v660_v44 = vpop.f32.mrb[20].mxu0 }
 0x1d2   : > { %v2800_v47 = vpop.eup %1947  ;;  %v801_v48 = vadd.f32 %v769_v35, %v2765_v1  ;;  %v771_v49 = vmul.f32 0.044715, %v739_v36  ;;  %v978_v52 = vpack.c.bf16 %v948_v38, %v946_v10  ;;  %v915_v53 = vmul.f32 0.5, %v2735_v27  ;;  %v662_v54 = vpop.f32.mrb[21].mxu0 }
 0x1d3   : > { %v2804_v57 = vpop.eup %1949  ;;  %v802_v2 = vadd.f32 %v770_v40, %v2771_v8  ;;  %v772_v62 = vmul.f32 0.044715, %v740_v41  ;;  %v945_v0 = vmul.f32 %v913_v43, %v2646_v58  ;;  %v2809_v3 = vadd.f32 %v660_v44, %v2641_v55  ;;  %v664_v12 = vpop.f32.mrb[22].mxu0 }
 0x1d4   : > { %v833_v4 = vmul.f32 0.7978846, %v801_v48  ;;  %v803_v6 = vadd.f32 %v771_v49, %v2778_v16  ;;  %1169 = vmatprep.mubr.bf16.mxu1 %v978_v52  ;;  %v947_v7 = vmul.f32 %v915_v53, %v2654_v63  ;;  %v2814_v27 = vadd.f32 %v662_v54, %v2643_v56  ;;  %v666_v9 = vpop.f32.mrb[23].mxu0 }
 0x1d5   : > { %v834_v10 = vmul.f32 0.7978846, %v802_v2  ;;  %v804_v11 = vadd.f32 %v772_v62, %v2784_v25  ;;  %v709_v58 = vmul.f32 %v2809_v3, %v2809_v3  ;;  %v2820_v13 = vadd.f32 %v664_v12, %v2641_v55 }
 0x1d6   : > { %1959 = vtanh.f32 %v833_v4  ;;  %v835_v15 = vmul.f32 0.7978846, %v803_v6  ;;  %v977_v19 = vpack.c.bf16 %v947_v7, %v945_v0  ;;  %v710_v20 = vmul.f32 %v2814_v27, %v2814_v27 }
 0x1d7   : > { %1961 = vtanh.f32 %v834_v10  ;;  %v836_v63 = vmul.f32 0.7978846, %v804_v11  ;;  %v741_v21 = vmul.f32 %v709_v58, %v2809_v3  ;;  %v711_v22 = vmul.f32 %v2820_v13, %v2820_v13 }
 0x1d8   : > { %v2827_v60 = vpop.eup %1951  ;;  %1963 = vtanh.f32 %v835_v15  ;;  %1170 = vmatmul.mubr.bf16.vlgmr.msra.gmra.mrb[0].mxu1 %v977_v19  ;;  %v742_v28 = vmul.f32 %v710_v20, %v2814_v27  ;;  %v2831_v29 = vadd.f32 %v666_v9, %v2643_v56  ;;  %v886_v30 = vadd.f32 1.0, %v2758_v50 }
 0x1d9   : > { %v2834_v32 = vpop.eup %1953  ;;  %1965 = vtanh.f32 %v836_v63  ;;  %v773_v33 = vmul.f32 0.044715, %v741_v21  ;;  %v743_v35 = vmul.f32 %v711_v22, %v2820_v13  ;;  %v888_v36 = vadd.f32 1.0, %v2767_v5  ;;  %v670_v38 = vpop.f32.mrb[24].mxu0 }
 0x1da   : > { %v2838_v40 = vpop.eup %1955  ;;  %v774_v41 = vmul.f32 0.044715, %v742_v28  ;;  %v712_v43 = vmul.f32 %v2831_v29, %v2831_v29  ;;  %v918_v44 = vmul.f32 0.5, %v886_v30  ;;  %v885_v48 = vadd.f32 1.0, %v2755_v45  ;;  %v672_v49 = vpop.f32.mrb[25].mxu0 }
 0x1db   : > { %v2843_v50 = vpop.eup %1957  ;;  %v805_v52 = vadd.f32 %v773_v33, %v2809_v3  ;;  %v775_v53 = vmul.f32 0.044715, %v743_v35  ;;  %v920_v54 = vmul.f32 0.5, %v888_v36  ;;  %v887_v2 = vadd.f32 1.0, %v2761_v61  ;;  %v674_v5 = vpop.f32.mrb[26].mxu0 }
 0x1dc   : > { %v806_v62 = vadd.f32 %v774_v41, %v2814_v27  ;;  %v744_v0 = vmul.f32 %v712_v43, %v2831_v29  ;;  %v950_v12 = vmul.f32 %v918_v44, %v2674_v17  ;;  %v917_v4 = vmul.f32 0.5, %v885_v48  ;;  %v676_v6 = vpop.f32.mrb[27].mxu0 }
 0x1dd   : > { %v837_v7 = vmul.f32 0.7978846, %v805_v52  ;;  %v807_v45 = vadd.f32 %v775_v53, %v2820_v13  ;;  %v952_v9 = vmul.f32 %v920_v54, %v2686_v26  ;;  %v919_v10 = vmul.f32 0.5, %v887_v2 }
 0x1de   : > { %v838_v11 = vmul.f32 0.7978846, %v806_v62  ;;  %v776_v58 = vmul.f32 0.044715, %v744_v0  ;;  %v949_v15 = vmul.f32 %v917_v4, %v2671_v14  ;;  %v2854_v61 = vadd.f32 %v670_v38, %v2641_v55 }
 0x1df   : > { %1967 = vtanh.f32 %v837_v7  ;;  %v839_v19 = vmul.f32 0.7978846, %v807_v45  ;;  %v980_v20 = vpack.c.bf16 %v952_v9, %v950_v12  ;;  %v951_v17 = vmul.f32 %v919_v10, %v2681_v23 }
 0x1e0   : > { %v2857_v63 = vpop.eup %1959  ;;  %1969 = vtanh.f32 %v838_v11  ;;  %v808_v21 = vadd.f32 %v776_v58, %v2831_v29  ;;  %v713_v26 = vmul.f32 %v2854_v61, %v2854_v61  ;;  %v2863_v22 = vadd.f32 %v672_v49, %v2643_v56 }
 0x1e1   : > { %v2865_v14 = vpop.eup %1961  ;;  %1971 = vtanh.f32 %v839_v19  ;;  %1177 = vmatprep.mubr.bf16.mxu1 %v980_v20  ;;  %v979_v28 = vpack.c.bf16 %v951_v17, %v949_v15  ;;  %v2868_v30 = vadd.f32 %v674_v5, %v2641_v55  ;;  %v2871_v23 = vadd.f32 %v676_v6, %v2643_v56  ;;  %v680_v33 = vpop.f32.mrb[28].mxu0 }
 0x1e2   : > { %v2873_v35 = vpop.eup %1963  ;;  %v840_v36 = vmul.f32 0.7978846, %v808_v21  ;;  %v745_v38 = vmul.f32 %v713_v26, %v2854_v61  ;;  %v714_v41 = vmul.f32 %v2863_v22, %v2863_v22  ;;  %v890_v43 = vadd.f32 1.0, %v2796_v39  ;;  %v682_v44 = vpop.f32.mrb[29].mxu0 }
 0x1e3   : > { %v2879_v48 = vpop.eup %1965  ;;  %1178 = vmatmul.mubr.bf16.gmra.mrb[4].mxu1 %v979_v28  ;;  %v715_v49 = vmul.f32 %v2868_v30, %v2868_v30  ;;  %v716_v52 = vmul.f32 %v2871_v23, %v2871_v23  ;;  %v892_v53 = vadd.f32 1.0, %v2804_v57  ;;  %v889_v54 = vadd.f32 1.0, %v2792_v34  ;;  %v684_v2 = vpop.f32.mrb[30].mxu0 }
 0x1e4   : > { %1973 = vtanh.f32 %v840_v36  ;;  %v777_v5 = vmul.f32 0.044715, %v745_v38  ;;  %v746_v62 = vmul.f32 %v714_v41, %v2863_v22  ;;  %v922_v39 = vmul.f32 0.5, %v890_v43  ;;  %v686_v0 = vpop.f32.mrb[31].mxu0 }
 0x1e5   : > { %v747_v12 = vmul.f32 %v715_v49, %v2868_v30  ;;  %v748_v4 = vmul.f32 %v716_v52, %v2871_v23  ;;  %v924_v6 = vmul.f32 0.5, %v892_v53  ;;  %v891_v7 = vadd.f32 1.0, %v2800_v47 }
 0x1e6   : > { %v809_v45 = vadd.f32 %v777_v5, %v2854_v61  ;;  %v778_v9 = vmul.f32 0.044715, %v746_v62  ;;  %v954_v57 = vmul.f32 %v922_v39, %v2703_v46  ;;  %v921_v34 = vmul.f32 0.5, %v889_v54 }
 0x1e7   : > { %v779_v10 = vmul.f32 0.044715, %v747_v12  ;;  %v780_v11 = vmul.f32 0.044715, %v748_v4  ;;  %v956_v58 = vmul.f32 %v924_v6, %v2715_v59  ;;  %v923_v15 = vmul.f32 0.5, %v891_v7 }
 0x1e8   : > { %v841_v19 = vmul.f32 0.7978846, %v809_v45  ;;  %v810_v20 = vadd.f32 %v778_v9, %v2863_v22  ;;  %v953_v17 = vmul.f32 %v921_v34, %v2699_v42  ;;  %v2897_v21 = vadd.f32 %v680_v33, %v2641_v55 }
 0x1e9   : > { %v2899_v47 = vpop.eup %1967  ;;  %v811_v26 = vadd.f32 %v779_v10, %v2868_v30  ;;  %v812_v46 = vadd.f32 %v780_v11, %v2871_v23  ;;  %v982_v28 = vpack.c.bf16 %v956_v58, %v954_v57  ;;  %v955_v36 = vmul.f32 %v923_v15, %v2709_v51 }
 0x1ea   : > { %v2904_v38 = vpop.eup %1969  ;;  %1975 = vtanh.f32 %v841_v19  ;;  %v842_v59 = vmul.f32 0.7978846, %v810_v20  ;;  %v717_v41 = vmul.f32 %v2897_v21, %v2897_v21  ;;  %v2909_v42 = vadd.f32 %v682_v44, %v2643_v56 }
 0x1eb   : > { %v2911_v33 = vpop.eup %1971  ;;  %v843_v43 = vmul.f32 0.7978846, %v811_v26  ;;  %v844_v49 = vmul.f32 0.7978846, %v812_v46  ;;  %1185 = vmatprep.mubr.bf16.mxu1 %v982_v28  ;;  %v981_v52 = vpack.c.bf16 %v955_v36, %v953_v17  ;;  %v2914_v53 = vadd.f32 %v684_v2, %v2641_v55 }
 0x1ec   : > { %1977 = vtanh.f32 %v842_v59  ;;  %v749_v51 = vmul.f32 %v717_v41, %v2897_v21  ;;  %v718_v54 = vmul.f32 %v2909_v42, %v2909_v42  ;;  %v2920_v5 = vadd.f32 %v686_v0, %v2643_v56 }
 0x1ed   : > { %1979 = vtanh.f32 %v843_v43  ;;  %1186 = vmatmul.mubr.bf16.gmra.mrb[8].mxu1 %v981_v52  ;;  %v719_v44 = vmul.f32 %v2914_v53, %v2914_v53  ;;  %v894_v62 = vadd.f32 1.0, %v2834_v32  ;;  %v896_v39 = vadd.f32 1.0, %v2843_v50 }
 0x1ee   : > { %v1974_v55 = vpop.eup %1973  ;;  %1981 = vtanh.f32 %v844_v49  ;;  %v781_v2 = vmul.f32 0.044715, %v749_v51  ;;  %v750_v12 = vmul.f32 %v718_v54, %v2909_v42  ;;  %v720_v4 = vmul.f32 %v2920_v5, %v2920_v5 }
 0x1ef   : > { %v751_v56 = vmul.f32 %v719_v44, %v2914_v53  ;;  %v926_v0 = vmul.f32 0.5, %v894_v62  ;;  %v928_v6 = vmul.f32 0.5, %v896_v39  ;;  %v893_v7 = vadd.f32 1.0, %v2827_v60 }
 0x1f0   : > { %v813_v45 = vadd.f32 %v781_v2, %v2897_v21  ;;  %v782_v9 = vmul.f32 0.044715, %v750_v12  ;;  %v752_v32 = vmul.f32 %v720_v4, %v2920_v5  ;;  %v895_v50 = vadd.f32 1.0, %v2838_v40 }
 0x1f1   : > { %v783_v57 = vmul.f32 0.044715, %v751_v56  ;;  %v958_v34 = vmul.f32 %v926_v0, %v2733_v24  ;;  %v960_v10 = vmul.f32 %v928_v6, %v2747_v37  ;;  %v925_v11 = vmul.f32 0.5, %v893_v7 }
 0x1f2   : > { %v845_v58 = vmul.f32 0.7978846, %v813_v45  ;;  %v814_v15 = vadd.f32 %v782_v9, %v2909_v42  ;;  %v784_v19 = vmul.f32 0.044715, %v752_v32  ;;  %v927_v20 = vmul.f32 0.5, %v895_v50 }
 0x1f3   : > { %v815_v60 = vadd.f32 %v783_v57, %v2914_v53  ;;  %v984_v17 = vpack.c.bf16 %v960_v10, %v958_v34  ;;  %v957_v26 = vmul.f32 %v925_v11, %v2729_v18  ;;  %v898_v46 = vadd.f32 1.0, %v2865_v14 }
 0x1f4   : > { %v1976_v28 = vpop.eup %1975  ;;  %1983 = vtanh.f32 %v845_v58  ;;  %v846_v40 = vmul.f32 0.7978846, %v814_v15  ;;  %v816_v24 = vadd.f32 %v784_v19, %v2920_v5  ;;  %v959_v37 = vmul.f32 %v927_v20, %v2741_v31 }
 0x1f5   : > { %v847_v36 = vmul.f32 0.7978846, %v815_v60  ;;  %1193 = vmatprep.mubr.bf16.mxu1 %v984_v17  ;;  %v900_v59 = vadd.f32 1.0, %v2879_v48  ;;  %v930_v41 = vmul.f32 0.5, %v898_v46  ;;  %v897_v43 = vadd.f32 1.0, %v2857_v63 }
 0x1f6   : > { %v1978_v49 = vpop.eup %1977  ;;  %1985 = vtanh.f32 %v846_v40  ;;  %v848_v52 = vmul.f32 0.7978846, %v816_v24  ;;  %v983_v18 = vpack.c.bf16 %v959_v37, %v957_v26  ;;  %v899_v14 = vadd.f32 1.0, %v2873_v35 }
 0x1f7   : > { %v1980_v51 = vpop.eup %1979  ;;  %1987 = vtanh.f32 %v847_v36  ;;  %v932_v54 = vmul.f32 0.5, %v900_v59  ;;  %v962_v44 = vmul.f32 %v930_v41, %v2771_v8  ;;  %v929_v62 = vmul.f32 0.5, %v897_v43 }
 0x1f8   : > { %v1982_v31 = vpop.eup %1981  ;;  %1989 = vtanh.f32 %v848_v52  ;;  %1194 = vmatmul.mubr.bf16.gmra.mrb[12].mxu1 %v983_v18  ;;  %v931_v39 = vmul.f32 0.5, %v899_v14  ;;  %v902_v48 = vadd.f32 1.0, %v2904_v38  ;;  %v904_v2 = vadd.f32 1.0, %v1974_v55  ;;  %v993_v18 = vld [vmem:[#allocation2] sm:$0xff] }
 0x1f9   : > { %v964_v63 = vmul.f32 %v932_v54, %v2784_v25  ;;  %v961_v12 = vmul.f32 %v929_v62, %v2765_v1  ;;  %v901_v4 = vadd.f32 1.0, %v2899_v47  ;;  %v903_v35 = vadd.f32 1.0, %v2911_v33 }
 0x1fa   : > { %v963_v56 = vmul.f32 %v931_v39, %v2778_v16  ;;  %v934_v0 = vmul.f32 0.5, %v902_v48  ;;  %v936_v8 = vmul.f32 0.5, %v904_v2  ;;  %v906_v6 = vadd.f32 1.0, %v1978_v49 }
 0x1fb   : > { %v986_v7 = vpack.c.bf16 %v964_v63, %v962_v44  ;;  %v933_v45 = vmul.f32 0.5, %v901_v4  ;;  %v935_v9 = vmul.f32 0.5, %v903_v35  ;;  %v908_v32 = vadd.f32 1.0, %v1982_v31  ;;  %v994_v44 = vld [vmem:[#allocation2 + $0x8] sm:$0xff]  ;;  %v995_v31 = vld [vmem:[#allocation2 + $0x10] sm:$0xff]  ;;  %v996_v63 = vld [vmem:[#allocation2 + $0x18] sm:$0xff] }
 0x1fc   : > { %v985_v50 = vpack.c.bf16 %v963_v56, %v961_v12  ;;  %v966_v38 = vmul.f32 %v934_v0, %v2814_v27  ;;  %v968_v25 = vmul.f32 %v936_v8, %v2831_v29  ;;  %v938_v55 = vmul.f32 0.5, %v906_v6  ;;  %v997_v8 = vld [vmem:[#allocation2 + $0x20] sm:$0xff] }
 0x1fd   : > { %1201 = vmatprep.mubr.bf16.mxu1 %v986_v7  ;;  %v965_v1 = vmul.f32 %v933_v45, %v2809_v3  ;;  %v967_v47 = vmul.f32 %v935_v9, %v2820_v13  ;;  %v940_v33 = vmul.f32 0.5, %v908_v32  ;;  %v905_v16 = vadd.f32 1.0, %v1976_v28  ;;  %v998_v9 = vld [vmem:[#allocation2 + $0x28] sm:$0xff] }
 0x1fe   : > { %v1984_v57 = vpop.eup %1983  ;;  %v988_v34 = vpack.c.bf16 %v968_v25, %v966_v38  ;;  %v970_v10 = vmul.f32 %v938_v55, %v2863_v22  ;;  %v907_v11 = vadd.f32 1.0, %v1980_v51 }
 0x1ff   : > { %v987_v58 = vpack.c.bf16 %v967_v47, %v965_v1  ;;  %v972_v15 = vmul.f32 %v940_v33, %v2871_v23  ;;  %v937_v19 = vmul.f32 0.5, %v905_v16  ;;  %v909_v27 = vadd.f32 1.0, %v1984_v57  ;;  %v999_v1 = vld [vmem:[#allocation2 + $0x30] sm:$0xff]  ;;  %v1000_v57 = vld [vmem:[#allocation2 + $0x38] sm:$0xff] }
 0x200   : > { %v1986_v20 = vpop.eup %1985  ;;  %1202 = vmatmul.mubr.bf16.gmra.mrb[16].mxu1 %v985_v50  ;;  %v939_v29 = vmul.f32 0.5, %v907_v11 }
 0x201   : > { %v1988_v60 = vpop.eup %1987  ;;  %1209 = vmatprep.mubr.bf16.mxu1 %v988_v34  ;;  %v990_v3 = vpack.c.bf16 %v972_v15, %v970_v10  ;;  %v910_v17 = vadd.f32 1.0, %v1986_v20  ;;  %v969_v26 = vmul.f32 %v937_v19, %v2854_v61  ;;  %v941_v22 = vmul.f32 0.5, %v909_v27  ;;  %v1001_v19 = vld [vmem:[#allocation2 + $0x40] sm:$0xff] }
 0x202   : > { %v1990_v13 = vpop.eup %1989  ;;  %v971_v46 = vmul.f32 %v939_v29, %v2868_v30  ;;  %v911_v28 = vadd.f32 1.0, %v1988_v60  ;;  %v1002_v60 = vld [vmem:[#allocation2 + $0x48] sm:$0xff] }
 0x203   : > { %v912_v40 = vadd.f32 1.0, %v1990_v13  ;;  %v942_v24 = vmul.f32 0.5, %v910_v17  ;;  %v973_v59 = vmul.f32 %v941_v22, %v2897_v21 }
 0x204   : > { %v989_v37 = vpack.c.bf16 %v971_v46, %v969_v26  ;;  %v943_v23 = vmul.f32 0.5, %v911_v28  ;;  %v1003_v28 = vld [vmem:[#allocation2 + $0x50] sm:$0xff] }
 0x205   : > { %v944_v36 = vmul.f32 0.5, %v912_v40  ;;  %v974_v43 = vmul.f32 %v942_v24, %v2909_v42 }
 0x206   : > { %v975_v41 = vmul.f32 %v943_v23, %v2914_v53 }
 0x207   : > { %v976_v49 = vmul.f32 %v944_v36, %v2920_v5 }
 0x208   : > { %1210 = vmatmul.mubr.bf16.gmra.mrb[20].mxu1 %v987_v58  ;;  %v991_v52 = vpack.c.bf16 %v975_v41, %v973_v59 }
 0x209   : > { %1217 = vmatprep.mubr.bf16.mxu1 %v990_v3  ;;  %v992_v61 = vpack.c.bf16 %v976_v49, %v974_v43  ;;  %v1005_v49 = vld [vmem:[#allocation2 + $0x60] sm:$0xff] }
 0x210   : > { %1218 = vmatmul.mubr.bf16.gmra.mrb[24].mxu1 %v989_v37  ;;  %v1004_v37 = vld [vmem:[#allocation2 + $0x58] sm:$0xff] }
 0x211   : > { %1225 = vmatprep.mubr.bf16.mxu1 %v992_v61 }
 0x218   : > { %1226 = vmatmul.mubr.bf16.gmra.mrb[28].mxu1 %v991_v52 }
 0x2ab   : > { %v1695_v30 = vpop.f32.mrb[0].mxu1 }
 0x2ac   : > { %v1696_v14 = vpop.f32.mrb[1].mxu1 }
 0x2ad   : > { %v1697_v51 = vadd.f32 %v1696_v14, %v1695_v30  ;;  %v1698_v54 = vpop.f32.mrb[2].mxu1 }
 0x2ae   : > { %v1699_v21 = vpop.f32.mrb[3].mxu1 }
 0x2af   : > { %v1234_v62 = vadd.f32 %v1697_v51, %v993_v18  ;;  %v1700_v53 = vadd.f32 %v1699_v21, %v1698_v54  ;;  %v1006_v18 = vld [vmem:[#allocation2 + $0x68] sm:$0xff] }
 0x2b1   : > { %1250 = vst [vmem:[#allocation2] sm:$0xff] %v1234_v62  ;;  %v1235_v42 = vadd.f32 %v1700_v53, %v994_v44  ;;  %v1007_v62 = vld [vmem:[#allocation2 + $0x70] sm:$0xff] }
 0x2b3   : > { %1251 = vst [vmem:[#allocation2 + $0x8] sm:$0xff] %v1235_v42 }
 0x2b6   : > { %v1701_v5 = vpop.f32.mrb[4].mxu1 }
 0x2b7   : > { %v1702_v39 = vpop.f32.mrb[5].mxu1 }
 0x2b8   : > { %v1703_v48 = vadd.f32 %v1702_v39, %v1701_v5  ;;  %v1704_v2 = vpop.f32.mrb[6].mxu1 }
 0x2b9   : > { %v1705_v12 = vpop.f32.mrb[7].mxu1 }
 0x2ba   : > { %v1236_v4 = vadd.f32 %v1703_v48, %v995_v31  ;;  %v1706_v35 = vadd.f32 %v1705_v12, %v1704_v2  ;;  %v1008_v31 = vld [vmem:[#allocation2 + $0x78] sm:$0xff]  ;;  %v1270_v12 = vld [vmem:[#allocation2] sm:$0xff] (!%p1591_p4) }
 0x2bc   : > { %1252 = vst [vmem:[#allocation2 + $0x10] sm:$0xff] %v1236_v4  ;;  %v1237_v56 = vadd.f32 %v1706_v35, %v996_v63  ;;  %v1271_v4 = vld [vmem:[#allocation2 + $0x8] sm:$0xff] (!%p1591_p4) }
 0x2be   : > { %1253 = vst [vmem:[#allocation2 + $0x18] sm:$0xff] %v1237_v56  ;;  %v1635_v56 = vpack.c.bf16 (!%p1591_p4), %v1271_v4, %v1270_v12 }
 0x2c0   : > { %v1707_v0 = vpop.f32.mrb[8].mxu1  ;;  %1636 = vst [vmem:[%s2590_s14] sm:$0xff] (!%p1591_p4), %v1635_v56  }
 0x2c1   : > { %v1708_v6 = vpop.f32.mrb[9].mxu1 }
 0x2c2   : > { %v1709_v7 = vadd.f32 %v1708_v6, %v1707_v0  ;;  %v1710_v45 = vpop.f32.mrb[10].mxu1 }
 0x2c3   : > { %v1711_v32 = vpop.f32.mrb[11].mxu1  ;;  %v1272_v35 = vld [vmem:[#allocation2 + $0x10] sm:$0xff] (!%p1591_p4) }
 0x2c4   : > { %v1238_v50 = vadd.f32 %v1709_v7, %v997_v8  ;;  %v1712_v38 = vadd.f32 %v1711_v32, %v1710_v45 }
 0x2c5   : > { %v1273_v0 = vld [vmem:[#allocation2 + $0x18] sm:$0xff] (!%p1591_p4) }
 0x2c6   : > { %1254 = vst [vmem:[#allocation2 + $0x20] sm:$0xff] %v1238_v50  ;;  %v1239_v25 = vadd.f32 %v1712_v38, %v998_v9  ;;  %v1640_v7 = vpack.c.bf16 (!%p1591_p4), %v1273_v0, %v1272_v35 }
 0x2c8   : > { %1255 = vst [vmem:[#allocation2 + $0x28] sm:$0xff] %v1239_v25  ;;  %1672 = vst [vmem:[%s2590_s14 + $0x8] sm:$0xff] (!%p1591_p4), %v1640_v7  }
 0x2cb   : > { %v1713_v55 = vpop.f32.mrb[12].mxu1 }
 0x2cc   : > { %v1714_v47 = vpop.f32.mrb[13].mxu1 }
 0x2cd   : > { %v1715_v33 = vadd.f32 %v1714_v47, %v1713_v55  ;;  %v1716_v16 = vpop.f32.mrb[14].mxu1  ;;  %v1274_v8 = vld [vmem:[#allocation2 + $0x20] sm:$0xff] (!%p1591_p4) }
 0x2ce   : > { %v1717_v34 = vpop.f32.mrb[15].mxu1 }
 0x2cf   : > { %v1240_v10 = vadd.f32 %v1715_v33, %v999_v1  ;;  %v1718_v11 = vadd.f32 %v1717_v34, %v1716_v16  ;;  %v1275_v6 = vld [vmem:[#allocation2 + $0x28] sm:$0xff] (!%p1591_p4) }
 0x2d0   : > { %v1645_v45 = vpack.c.bf16 (!%p1591_p4), %v1275_v6, %v1274_v8 }
 0x2d1   : > { %1256 = vst [vmem:[#allocation2 + $0x30] sm:$0xff] %v1240_v10  ;;  %v1241_v58 = vadd.f32 %v1718_v11, %v1000_v57 }
 0x2d2   : > { %1673 = vst [vmem:[%s2590_s14 + $0x10] sm:$0xff] (!%p1591_p4), %v1645_v45  }
 0x2d3   : > { %1257 = vst [vmem:[#allocation2 + $0x38] sm:$0xff] %v1241_v58  ;;  %v1719_v15 = vpop.f32.mrb[16].mxu1 }
 0x2d4   : > { %v1720_v27 = vpop.f32.mrb[17].mxu1 }
 0x2d5   : > { %v1721_v20 = vadd.f32 %v1720_v27, %v1719_v15  ;;  %v1722_v29 = vpop.f32.mrb[18].mxu1 }
 0x2d6   : > { %v1723_v3 = vpop.f32.mrb[19].mxu1 }
 0x2d7   : > { %v1242_v17 = vadd.f32 %v1721_v20, %v1001_v19  ;;  %v1724_v13 = vadd.f32 %v1723_v3, %v1722_v29 }
 0x2d8   : > { %v1276_v9 = vld [vmem:[#allocation2 + $0x30] sm:$0xff] (!%p1591_p4) }
 0x2d9   : > { %1258 = vst [vmem:[#allocation2 + $0x40] sm:$0xff] %v1242_v17  ;;  %v1243_v26 = vadd.f32 %v1724_v13, %v1002_v60 }
 0x2da   : > { %v1277_v32 = vld [vmem:[#allocation2 + $0x38] sm:$0xff] (!%p1591_p4) }
 0x2db   : > { %1259 = vst [vmem:[#allocation2 + $0x48] sm:$0xff] %v1243_v26  ;;  %v1725_v46 = vpop.f32.mrb[20].mxu1  ;;  %v1650_v38 = vpack.c.bf16 (!%p1591_p4), %v1277_v32, %v1276_v9 }
 0x2dc   : > { %v1726_v22 = vpop.f32.mrb[21].mxu1 }
 0x2dd   : > { %v1727_v40 = vadd.f32 %v1726_v22, %v1725_v46  ;;  %v1728_v24 = vpop.f32.mrb[22].mxu1  ;;  %1674 = vst [vmem:[%s2590_s14 + $0x18] sm:$0xff] (!%p1591_p4), %v1650_v38  }
 0x2de   : > { %v1729_v23 = vpop.f32.mrb[23].mxu1 }
 0x2df   : > { %v1244_v36 = vadd.f32 %v1727_v40, %v1003_v28  ;;  %v1730_v59 = vadd.f32 %v1729_v23, %v1728_v24 }
 0x2e0   : > { %v1278_v50 = vld [vmem:[#allocation2 + $0x40] sm:$0xff] (!%p1591_p4) }
 0x2e1   : > { %1260 = vst [vmem:[#allocation2 + $0x50] sm:$0xff] %v1244_v36  ;;  %v1245_v41 = vadd.f32 %v1730_v59, %v1004_v37 }
 0x2e2   : > { %v1279_v25 = vld [vmem:[#allocation2 + $0x48] sm:$0xff] (!%p1591_p4) }
 0x2e3   : > { %1261 = vst [vmem:[#allocation2 + $0x58] sm:$0xff] %v1245_v41  ;;  %v1731_v43 = vpop.f32.mrb[24].mxu1  ;;  %v1655_v47 = vpack.c.bf16 (!%p1591_p4), %v1279_v25, %v1278_v50 }
 0x2e4   : > { %v1732_v52 = vpop.f32.mrb[25].mxu1 }
 0x2e5   : > { %v1733_v61 = vadd.f32 %v1732_v52, %v1731_v43  ;;  %v1734_v30 = vpop.f32.mrb[26].mxu1  ;;  %1675 = vst [vmem:[%s2590_s14 + $0x20] sm:$0xff] (!%p1591_p4), %v1655_v47  }
 0x2e6   : > { %v1735_v14 = vpop.f32.mrb[27].mxu1 }
 0x2e7   : > { %v1246_v51 = vadd.f32 %v1733_v61, %v1005_v49  ;;  %v1736_v54 = vadd.f32 %v1735_v14, %v1734_v30 }
 0x2e8   : > { %v1280_v55 = vld [vmem:[#allocation2 + $0x50] sm:$0xff] (!%p1591_p4) }
 0x2e9   : > { %1262 = vst [vmem:[#allocation2 + $0x60] sm:$0xff] %v1246_v51  ;;  %v1247_v44 = vadd.f32 %v1736_v54, %v1006_v18 }
 0x2ea   : > { %v1281_v1 = vld [vmem:[#allocation2 + $0x58] sm:$0xff] (!%p1591_p4) }
 0x2eb   : > { %1263 = vst [vmem:[#allocation2 + $0x68] sm:$0xff] %v1247_v44  ;;  %v1737_v21 = vpop.f32.mrb[28].mxu1  ;;  %v1660_v33 = vpack.c.bf16 (!%p1591_p4), %v1281_v1, %v1280_v55 }
 0x2ec   : > { %v1738_v53 = vpop.f32.mrb[29].mxu1 }
 0x2ed   : > { %v1739_v42 = vadd.f32 %v1738_v53, %v1737_v21  ;;  %v1740_v5 = vpop.f32.mrb[30].mxu1  ;;  %1269 = sbr.rel (%p1591_p4) target bundleno = 766 (0x2fe), region = 60  ;;  %1676 = vst [vmem:[%s2590_s14 + $0x28] sm:$0xff] (!%p1591_p4), %v1660_v33  }
 0x2ee   : > { %v1741_v39 = vpop.f32.mrb[31].mxu1 }
 0x2ef   : > { %v1248_v48 = vadd.f32 %v1739_v42, %v1007_v62  ;;  %v1742_v2 = vadd.f32 %v1741_v39, %v1740_v5 }
 0x2f0   : > { %v1282_v16 = vld [vmem:[#allocation2 + $0x60] sm:$0xff] (!%p1591_p4) }
 0x2f1   : > { %1264 = vst [vmem:[#allocation2 + $0x70] sm:$0xff] %v1248_v48  ;;  %v1249_v63 = vadd.f32 %v1742_v2, %v1008_v31 }
 0x2f2   : > { %v1283_v57 = vld [vmem:[#allocation2 + $0x68] sm:$0xff] (!%p1591_p4) }
 0x2f3   : > { %1265 = vst [vmem:[#allocation2 + $0x78] sm:$0xff] %v1249_v63  ;;  %v1665_v10 = vpack.c.bf16 (!%p1591_p4), %v1283_v57, %v1282_v16 }
 0x2f5   : > { %1677 = vst [vmem:[%s2590_s14 + $0x30] sm:$0xff] %v1665_v10  }
 0x2f8   : > { %v1284_v34 = vld [vmem:[#allocation2 + $0x70] sm:$0xff] }
 0x2fa   : > { %v1285_v11 = vld [vmem:[#allocation2 + $0x78] sm:$0xff] }
 0x2fb   : > { %v1670_v58 = vpack.c.bf16 %v1285_v11, %v1284_v34 }
 0x2fd   : > { %1678 = vst [vmem:[%s2590_s14 + $0x38] sm:$0xff] %v1670_v58  }
 0x2fe PF: > { %s3122_s10 = sld [smem:[#allocation17_spill]]  ;;  %s3123_s7 = sld [smem:[#allocation18_spill]] }
 0x2ff   : > { %s3124_s19 = sld [smem:[#allocation24_spill]]  ;;  %s1382_s15 = sshll.u32 %s2590_s14, 4  ;;  %s2976_s15 = int_to_ptr.vmem [resolvable:$true] %s1382_s15 }
 0x300   : > { %s3125_s6 = sld [smem:[#allocation28_spill]]  ;;  %s1367_s24 = scalar_lea.sflag [#allocation5], %s2563_s25 }
 0x301   : > { %s2081_s1 = scalar_lea.vmem %s2976_s15, 1024  ;;  %s2234_s16 = smov [#allocation9]  }
 0x302   : > { %p2082_p9 = scmp.ne.s32.totalorder %s2976_s15, %s2081_s1  ;;  %s2085_s14 = sshll.u32 %s2234_s16, 4  ;;  %s2086_s14 = int_to_ptr.vmem [resolvable:$false] %s2085_s14 }
 0x303   : > { %s2087_s17 = scalar_lea.vmem %s2086_s14, 2048  ;;  %p2088_p1 = scmp.lt.s32.totalorder %s2976_s15, %s2086_s14 }
 0x304   : > { %s1609_s5 = sshll.u32 %s3122_s10, 4  ;;  %s1610_s20 = sshll.u32 %s3123_s7, 5 }
 0x305   : > { %s1379_s26 = sadd.s32 %s1610_s20, %s1609_s5  ;;  %p3126_p13 = scmp.ne.s32.totalorder %s3124_s19, 0 }
 0x306   : > { %s1611_s11 = sshll.u32 %s1379_s26, 6  ;;  %p2089_p0 = scmp.lt.s32.totalorder %s2087_s17, %s2081_s1 }
 0x307   : > { %s2981_s13 = scalar_lea.hbm %s3125_s6, %s1611_s11  ;;  %p2083_p10 = pnand %p2082_p9, %p3126_p13 }
 0x308   : > { %p2090_p6 = por %p2089_p0, %p2088_p1 }
 0x309   : > { %p2084_p5 = pneg %p2083_p10 }
 0x30b   : > { %p2091_p11 = pnand %p2090_p6, %p2084_p5 }
 0x30d   : > { %2094 = shalt.err (!%p2091_p11)
}
 0x30e   : > { %s2095_s21 = scalar_lea.hbm %s2981_s13, 1024  ;;  %s2099_s10 = scalar_lea.hbm %s3125_s6, 4096 }
 0x30f   : > { %p2096_p12 = scmp.ne.s32.totalorder %s2981_s13, %s2095_s21  ;;  %p2100_p8 = scmp.lt.u32.totalorder %s2981_s13, %s3125_s6 }
 0x310   : > { %p2101_p2 = scmp.lt.u32.totalorder %s2099_s10, %s2095_s21  ;;  %p2103_p9 = scmp.lt.u32.totalorder %s2095_s21, %s2981_s13 }
 0x311   : > { %p2097_p3 = pnand %p2096_p12, %p3126_p13 }
 0x312   : > { %p2102_p4 = por %p2101_p2, %p2100_p8 }
 0x313   : > { %p2098_p7 = pneg %p2097_p3 }
 0x314   : > { %p2104_p10 = por %p2103_p9, %p2102_p4 }
 0x316   : > { %p2105_p5 = pnand %p2104_p10, %p2098_p7 }
 0x318   : > { %2108 = shalt.err (!%p2105_p5)
}
 0x319   : > { %s2235_s20 = smov 64   ;;  %s2236_s26 = smov 4  }
 0x31a   : > { %1749 = dma.vmem_to_hbm [thread:$0]  (%p3126_p13), %s2976_s15, 1024, %s2981_s13, %s1367_s24, %s2235_s20, %s2235_s20, %s2236_s26  }
 0x31b PF: > { %s3127_s11 = sld [smem:[#allocation15_spill]]  ;;  %p1766_p1 = scmp.ge.s32.totalorder %s2223_s30, 2 }
 0x31c   : > { %p3128_p0 = scmp.ne.s32.totalorder %s3107_s12, 0 }
 0x31e   : > { %p1762_p6 = pnand %p1766_p1, %p3128_p0 }
 0x321   : > { %s1397_s2 = sand.u32 1, %s3127_s11  }
 0x322   : > { %s1398_s18 = scalar_lea.sflag [#allocation5], %s1397_s2 }
 0x323   : > { %2170 = dma.done.wait (!%p1762_p6), %s1398_s18, 1024  }
 0x324   : > { %2172 = vsyncadd (!%p1762_p6), %s1398_s18, 4294966272  ;;  %s24_s30 = sadd.s32 1, %s2223_s30   ;;  %s3130_s18 = sld [smem:[#allocation13_spill]] }
 0x325   : > { %p3012_p11 = scmp.ge.s32.totalorder %s24_s30, 10   ;;  %s3131_s19 = sld [smem:[#allocation14_spill]] }
 0x326   : > { %s3132_s20 = sld [smem:[#allocation20_spill]]  ;;  %s3133_s12 = sld [smem:[#allocation19_spill]] }
 0x327   : > { %s3134_s15 = sld [smem:[#allocation21_spill]]  ;;  %s3135_s13 = sld [smem:[#allocation23_spill]] }
 0x328   : > { %s3136_s21 = smov %s2191_s22  ;;  %s3137_s22 = smov %s2195_s23 }
 0x329   : > { %s3138_s23 = smov %s2475_s4  ;;  %s3139_s24 = smov %s2211_s27 }
 0x32a   : > { %s3140_s25 = smov %s2215_s28  ;;  %s3141_s26 = smov %s2219_s29 }
 0x32b   :  { %23 = sbr.rel (!%p3012_p11) target bundleno = 17 (0x11), region = 120 }
 0x32c   : > { %s3142_s27 = smov %s3133_s12 }
 0x32d   : > { %s3143_s28 = smov %s3134_s15  ;;  %s3144_s29 = smov %s3135_s13 }
 0x332   :  { %1403 = vsyncpa [#allocation4], 1 }
 0x333   :  { %1405 = vsyncpa [#allocation4 + $0x1], 1 }
 0x334   :  { %1406 = vsyncpa [#allocation7], 1 }
 0x335   :  { %1408 = vsyncpa [#allocation7 + $0x1], 1 }
 0x336   :  { %1409 = vsyncpa [#allocation5], 1 }
 0x337   :  { %1411 = vsyncpa [#allocation5 + $0x1], 1 }

</bundles_post_ra>
